<compile_context>
chip_gen: v5e
topology: v5e:2x2
jax: 0.10.0
libtpu: 0.0.40
codegen_flags: <defaults>
</compile_context>

<pallas_src>
import functools

import jax
import jax.numpy as jnp
from jax.experimental import pallas as pl
from jax.experimental.pallas import tpu as pltpu

LANES = 128


def _round_up(x, m):
    return (x + m - 1) // m * m


def _block_kernel(xs_ref, dww_ref, b1_ref, pww_ref, b2_ref, out_ref,
                  *, stride, th, wo):
    """One grid step = one row strip (or whole image) of one sample.

    xs_ref : (1, TH*stride+2, Wp, Cin_p) bf16  zero-padded NHWC input strip
    dww_ref: (3, 3, Cin_p) f32                 depthwise weights, BN1 scale folded
    b1_ref : (1, Cin_p) f32                    folded BN1 bias
    pww_ref: (Cin_p, Cout_p) bf16              pointwise weights, BN2 scale folded
    b2_ref : (1, Cout_p) f32                   folded BN2 bias
    out_ref: (1, TH*Wo, Cout_p) bf16
    """
    cin = dww_ref.shape[2]
    dww = dww_ref[...]                                   # (3, 3, Cin_p) f32
    # bf16 in HBM/VMEM, f32 for the VPU math (safe on all generations).
    x = xs_ref[0].astype(jnp.float32)                    # (TH_in, Wp, Cin_p)

    def tap(di, dj):
        # Strided slices on the loaded VALUE (not on the ref) — lowers cleanly
        # for both stride==1 and stride>1; only kept outputs are computed.
        return x[di:di + (th - 1) * stride + 1:stride,
                 dj:dj + (wo - 1) * stride + 1:stride, :]

    # Depthwise 3x3 conv: 9 shifted per-channel FMAs on the VPU.  First tap of
    # each row seeds the partial (no zero-fill); 3 independent chains so the 4
    # VALU slots can co-issue.
    rows = []
    for di in range(3):
        p = tap(di, 0) * dww[di, 0][None, None, :]
        p = p + tap(di, 1) * dww[di, 1][None, None, :]
        p = p + tap(di, 2) * dww[di, 2][None, None, :]
        rows.append(p)
    acc = (rows[0] + rows[1]) + rows[2]                  # (th, wo, Cin_p) f32

    # BN1 bias (scale already folded into dww) + ReLU.
    y = jnp.maximum(acc + b1_ref[0][None, None, :], 0.0)

    # Pointwise 1x1 conv == channel matmul on the MXU (bf16 in, f32 acc).
    # wo is kept a multiple of 8 where possible so this reshape is a relabel.
    y2 = jnp.dot(y.reshape(th * wo, cin).astype(jnp.bfloat16),
                 pww_ref[...],
                 preferred_element_type=jnp.float32)     # (th*wo, Cout_p)

    # BN2 bias (scale folded into pww) + ReLU; single lane-dense bf16 store.
    out_ref[0] = jnp.maximum(y2 + b2_ref[0][None, :], 0.0).astype(out_ref.dtype)


def _fold_bn(gamma, beta, mean, var, eps=1e-5):
    scale = gamma / jnp.sqrt(var + eps)
    bias = beta - mean * scale
    return scale, bias


def _vmem_limit_bytes():
    """Generation-aware scoped-VMEM limit (v7x has 64 MiB/TC, v5e/v6e 128)."""
    try:
        cap = int(getattr(pltpu.get_tpu_info(), "vmem_capacity_bytes",
                          64 * 1024 * 1024))
    except Exception:
        cap = 64 * 1024 * 1024
    return min((cap * 5) // 8, 80 * 1024 * 1024)


def _pick_tile_h(ho, wo, wp, cin_p, cout_p, stride, budget_bytes):
    """Largest divisor of Ho whose full per-step working set fits the budget.

    Counts double-buffered bf16 input & output blocks plus the in-kernel f32
    temporaries.  Prefers tiles whose TH*Wo is sublane (8) aligned so the
    in-kernel reshape and the output store stay dense.
    """
    def strip_bytes(th):
        th_in = th * stride + 2
        in_b = 2 * th_in * wp * cin_p * 2        # double-buffered bf16 input
        out_b = 2 * th * wo * cout_p * 2         # double-buffered bf16 output
        tmp_b = th_in * wp * cin_p * 4           # f32 upcast of the strip
        tmp_b += 4 * th * wo * cin_p * 4         # depthwise partials / acc / y
        tmp_b += th * wo * cout_p * 4            # matmul f32 accumulator
        return in_b + out_b + tmp_b

    divisors = [d for d in range(1, ho + 1) if ho % d == 0]
    fits = [d for d in divisors if strip_bytes(d) <= budget_bytes]
    if not fits:
        return 1
    aligned = [d for d in fits if (d * wo) % 8 == 0]
    return max(aligned) if aligned else max(fits)


def mobilenet_block_nhwc(x_nhwc, dw_w, bn1, pw_w, bn2, stride=1):
    """NHWC-in / NHWC-out fused block (keeps chained blocks in NHWC bf16).

    x_nhwc: (N, H, W, Cin). dw_w: (Cin,1,3,3). pw_w: (Cout,Cin,1,1).
    Returns (N, Ho, Wo, Cout) bf16.
    """
    N, H, W, Cin = x_nhwc.shape
    Cout = pw_w.shape[0]
    assert H % stride == 0 and W % stride == 0
    Ho, Wo = H // stride, W // stride
    Hp, Wp = H + 2, W + 2
    Cin_p, Cout_p = _round_up(Cin, LANES), _round_up(Cout, LANES)

    # ---- host-side weight prep (folds BN scales into the conv weights) ----
    s1, b1 = _fold_bn(*bn1)
    s2, b2 = _fold_bn(*bn2)
    dww = jnp.transpose(dw_w[:, 0, :, :], (1, 2, 0)) * s1[None, None, :]
    dww = jnp.pad(dww, ((0, 0), (0, 0), (0, Cin_p - Cin))).astype(jnp.float32)
    pww = jnp.transpose(pw_w[:, :, 0, 0], (1, 0)) * s2[None, :]
    pww = jnp.pad(pww, ((0, Cin_p - Cin), (0, Cout_p - Cout))).astype(jnp.bfloat16)
    b1p = jnp.pad(b1, (0, Cin_p - Cin)).reshape(1, Cin_p).astype(jnp.float32)
    b2p = jnp.pad(b2, (0, Cout_p - Cout)).reshape(1, Cout_p).astype(jnp.float32)

    # ---- single fused producer: bf16 cast + spatial zero-pad + channel pad ----
    xp = jnp.pad(x_nhwc.astype(jnp.bfloat16),
                 ((0, 0), (1, 1), (1, 1), (0, Cin_p - Cin)))

    # ---- generation-aware tiling (whole image per step whenever it fits) ----
    vmem_limit = _vmem_limit_bytes()
    w_bytes = 2 * (dww.size * 4 + pww.size * 2 + b1p.size * 4 + b2p.size * 4)
    budget = max((vmem_limit - w_bytes) // 2, 1 << 20)
    TH = _pick_tile_h(Ho, Wo, Wp, Cin_p, Cout_p, stride, budget)
    T = Ho // TH
    TH_in = TH * stride + 2

    if T == 1:
        x_in = xp                                   # no copy: TH_in == Hp
    else:
        # Rare fallback for images too large for one VMEM strip.
        # TODO(synk): use a pl.Element row-offset BlockSpec to DMA overlapping
        # strips directly from xp instead of materializing this copy.
        x_in = jnp.concatenate(
            [xp[:, t * TH * stride: t * TH * stride + TH_in][:, None]
             for t in range(T)], axis=1)
        x_in = x_in.reshape(N * T, TH_in, Wp, Cin_p)
    NT = N * T

    flops = NT * TH * Wo * (18 * Cin_p + 2 * Cin_p * Cout_p)
    bytes_accessed = (x_in.size * 2 + dww.size * 4 + pww.size * 2
                      + b1p.size * 4 + b2p.size * 4 + NT * TH * Wo * Cout_p * 2)

    out = pl.pallas_call(
        functools.partial(_block_kernel, stride=stride, th=TH, wo=Wo),
        out_shape=jax.ShapeDtypeStruct((NT, TH * Wo, Cout_p), jnp.bfloat16),
        grid=(NT,),
        in_specs=[
            pl.BlockSpec((1, TH_in, Wp, Cin_p), lambda i: (i, 0, 0, 0)),
            # NOTE: the constant operands below could be single-buffered via
            # pipeline_mode=pl.Buffered(1); instead their double-buffered
            # footprint is subtracted from the strip budget above.
            pl.BlockSpec((3, 3, Cin_p), lambda i: (0, 0, 0)),
            pl.BlockSpec((1, Cin_p), lambda i: (0, 0)),
            pl.BlockSpec((Cin_p, Cout_p), lambda i: (0, 0)),
            pl.BlockSpec((1, Cout_p), lambda i: (0, 0)),
        ],
        out_specs=pl.BlockSpec((1, TH * Wo, Cout_p), lambda i: (i, 0, 0)),
        compiler_params=pltpu.CompilerParams(
            dimension_semantics=("parallel",),
            vmem_limit_bytes=int(vmem_limit)),
        cost_estimate=pl.CostEstimate(
            flops=int(flops), transcendentals=0,
            bytes_accessed=int(bytes_accessed)),
    )(x_in, dww, b1p, pww, b2p)

    # (NT, TH*Wo, Cout_p) -> (N, Ho, Wo, Cout)  (reshape only, no relayout)
    return out.reshape(N, Ho, Wo, Cout_p)[..., :Cout]


@functools.partial(jax.jit, static_argnums=(5,))
def mobilenet_block(x_nchw, dw_w, bn1, pw_w, bn2, stride=1):
    """Drop-in NCHW f32 wrapper matching the PyTorch module interface."""
    x = jnp.transpose(x_nchw, (0, 2, 3, 1))
    out = mobilenet_block_nhwc(x, dw_w, bn1, pw_w, bn2, stride)
    return jnp.transpose(out, (0, 3, 1, 2)).astype(jnp.float32)


def _reference_block(x_nchw, dw_w, bn1, pw_w, bn2, stride=1, eps=1e-5):
    """Pure-JAX reference mirroring PyTorch semantics (inference-mode BN)."""
    def bn(y, params):
        g, b, m, v = params
        return ((y - m[None, :, None, None])
                / jnp.sqrt(v[None, :, None, None] + eps)
                * g[None, :, None, None] + b[None, :, None, None])

    y = jax.lax.conv_general_dilated(
        x_nchw, dw_w, window_strides=(stride, stride),
        padding=((1, 1), (1, 1)), feature_group_count=x_nchw.shape[1],
        dimension_numbers=("NCHW", "OIHW", "NCHW"))
    y = jnp.maximum(bn(y, bn1), 0.0)
    y = jax.lax.conv_general_dilated(
        y, pw_w, window_strides=(1, 1), padding="VALID",
        dimension_numbers=("NCHW", "OIHW", "NCHW"))
    return jnp.maximum(bn(y, bn2), 0.0)


if __name__ == "__main__":
    key = jax.random.PRNGKey(0)
    N, Cin, Cout, H, W = 2, 8, 16, 16, 16

    ks = jax.random.split(key, 9)
    x = jax.random.normal(ks[0], (N, Cin, H, W), jnp.float32)
    dw_w = 0.1 * jax.random.normal(ks[1], (Cin, 1, 3, 3), jnp.float32)
    pw_w = 0.1 * jax.random.normal(ks[2], (Cout, Cin, 1, 1), jnp.float32)
    bn1 = (jax.random.uniform(ks[3], (Cin,), jnp.float32, 0.5, 1.5),   # gamma
           0.1 * jax.random.normal(ks[4], (Cin,), jnp.float32),        # beta
           0.1 * jax.random.normal(ks[5], (Cin,), jnp.float32),        # running_mean
           jax.random.uniform(ks[6], (Cin,), jnp.float32, 0.5, 1.5))   # running_var
    bn2 = (jax.random.uniform(ks[7], (Cout,), jnp.float32, 0.5, 1.5),
           0.1 * jax.random.normal(ks[8], (Cout,), jnp.float32),
           jnp.zeros((Cout,), jnp.float32),
           jnp.ones((Cout,), jnp.float32))

    # Validate both stride=1 and stride=2 against the reference.  Tolerance
    # accounts for the bf16 activation streams and the bf16 MXU matmul.
    for stride in (1, 2):
        out = jax.block_until_ready(
            mobilenet_block(x, dw_w, bn1, pw_w, bn2, stride))
        ref = jax.block_until_ready(
            _reference_block(x, dw_w, bn1, pw_w, bn2, stride))
        assert out.shape == ref.shape == (N, Cout, H // stride, W // stride)
        err = float(jnp.max(jnp.abs(out - ref)))
        assert jnp.allclose(out, ref, rtol=3e-2, atol=3e-2), (stride, err)

    print("KERNEL_OK")
</pallas_src>

<mosaic_0001>
module attributes {stable_mosaic.version = 11 : i64} {
  func.func @_block_kernel(%arg0: i32, %arg1: memref<1x18x18x128xbf16, #tpu.memory_space<vmem>>, %arg2: memref<3x3x128xf32, #tpu.memory_space<vmem>>, %arg3: memref<1x128xf32, #tpu.memory_space<vmem>>, %arg4: memref<128x128xbf16, #tpu.memory_space<vmem>>, %arg5: memref<1x128xf32, #tpu.memory_space<vmem>>, %arg6: memref<1x256x128xbf16, #tpu.memory_space<vmem>>) attributes {dimension_semantics = [#tpu.dimension_semantics<parallel>], iteration_bounds = array<i64: 2>, scalar_prefetch = 0 : i64, scratch_operands = 0 : i64, tpu.core_type = #tpu.core_type<tc>, window_params = [{transform_indices = @transform_0, window_bounds = array<i64: 1, 18, 18, 128>}, {pipeline_mode = #tpu.pipeline_mode<synchronous>, transform_indices = @transform_1, window_bounds = array<i64: 3, 3, 128>}, {pipeline_mode = #tpu.pipeline_mode<synchronous>, transform_indices = @transform_2, window_bounds = array<i64: 1, 128>}, {pipeline_mode = #tpu.pipeline_mode<synchronous>, transform_indices = @transform_3, window_bounds = array<i64: 128, 128>}, {pipeline_mode = #tpu.pipeline_mode<synchronous>, transform_indices = @transform_4, window_bounds = array<i64: 1, 128>}, {transform_indices = @transform_5, window_bounds = array<i64: 1, 256, 128>}]} {
    %c0 = arith.constant 0 : index
    %c0_0 = arith.constant 0 : index
    %c0_1 = arith.constant 0 : index
    %0 = vector.load %arg2[%c0, %c0_0, %c0_1] : memref<3x3x128xf32, #tpu.memory_space<vmem>>, vector<3x3x128xf32>
    %c0_2 = arith.constant 0 : index
    %c0_3 = arith.constant 0 : index
    %c0_4 = arith.constant 0 : index
    %c0_5 = arith.constant 0 : index
    %1 = vector.load %arg1[%c0_2, %c0_3, %c0_4, %c0_5] : memref<1x18x18x128xbf16, #tpu.memory_space<vmem>>, vector<1x18x18x128xbf16>
    %2 = vector.shape_cast %1 : vector<1x18x18x128xbf16> to vector<18x18x128xbf16>
    %3 = arith.extf %2 : vector<18x18x128xbf16> to vector<18x18x128xf32>
    %4 = vector.extract_strided_slice %3 {offsets = [0, 0, 0], sizes = [16, 16, 128], strides = [1, 1, 1]} : vector<18x18x128xf32> to vector<16x16x128xf32>
    %5 = vector.extract_strided_slice %0 {offsets = [0, 0, 0], sizes = [1, 1, 128], strides = [1, 1, 1]} : vector<3x3x128xf32> to vector<1x1x128xf32>
    %6 = vector.shape_cast %5 : vector<1x1x128xf32> to vector<128xf32>
    %7 = vector.shape_cast %6 : vector<128xf32> to vector<1x1x128xf32>
    %8 = vector.broadcast %7 : vector<1x1x128xf32> to vector<16x16x128xf32>
    %9 = arith.mulf %4, %8 : vector<16x16x128xf32>
    %10 = vector.extract_strided_slice %3 {offsets = [0, 1, 0], sizes = [16, 16, 128], strides = [1, 1, 1]} : vector<18x18x128xf32> to vector<16x16x128xf32>
    %11 = vector.extract_strided_slice %0 {offsets = [0, 1, 0], sizes = [1, 1, 128], strides = [1, 1, 1]} : vector<3x3x128xf32> to vector<1x1x128xf32>
    %12 = vector.shape_cast %11 : vector<1x1x128xf32> to vector<128xf32>
    %13 = vector.shape_cast %12 : vector<128xf32> to vector<1x1x128xf32>
    %14 = vector.broadcast %13 : vector<1x1x128xf32> to vector<16x16x128xf32>
    %15 = arith.mulf %10, %14 : vector<16x16x128xf32>
    %16 = arith.addf %9, %15 : vector<16x16x128xf32>
    %17 = vector.extract_strided_slice %3 {offsets = [0, 2, 0], sizes = [16, 16, 128], strides = [1, 1, 1]} : vector<18x18x128xf32> to vector<16x16x128xf32>
    %18 = vector.extract_strided_slice %0 {offsets = [0, 2, 0], sizes = [1, 1, 128], strides = [1, 1, 1]} : vector<3x3x128xf32> to vector<1x1x128xf32>
    %19 = vector.shape_cast %18 : vector<1x1x128xf32> to vector<128xf32>
    %20 = vector.shape_cast %19 : vector<128xf32> to vector<1x1x128xf32>
    %21 = vector.broadcast %20 : vector<1x1x128xf32> to vector<16x16x128xf32>
    %22 = arith.mulf %17, %21 : vector<16x16x128xf32>
    %23 = arith.addf %16, %22 : vector<16x16x128xf32>
    %24 = vector.extract_strided_slice %3 {offsets = [1, 0, 0], sizes = [16, 16, 128], strides = [1, 1, 1]} : vector<18x18x128xf32> to vector<16x16x128xf32>
    %25 = vector.extract_strided_slice %0 {offsets = [1, 0, 0], sizes = [1, 1, 128], strides = [1, 1, 1]} : vector<3x3x128xf32> to vector<1x1x128xf32>
    %26 = vector.shape_cast %25 : vector<1x1x128xf32> to vector<128xf32>
    %27 = vector.shape_cast %26 : vector<128xf32> to vector<1x1x128xf32>
    %28 = vector.broadcast %27 : vector<1x1x128xf32> to vector<16x16x128xf32>
    %29 = arith.mulf %24, %28 : vector<16x16x128xf32>
    %30 = vector.extract_strided_slice %3 {offsets = [1, 1, 0], sizes = [16, 16, 128], strides = [1, 1, 1]} : vector<18x18x128xf32> to vector<16x16x128xf32>
    %31 = vector.extract_strided_slice %0 {offsets = [1, 1, 0], sizes = [1, 1, 128], strides = [1, 1, 1]} : vector<3x3x128xf32> to vector<1x1x128xf32>
    %32 = vector.shape_cast %31 : vector<1x1x128xf32> to vector<128xf32>
    %33 = vector.shape_cast %32 : vector<128xf32> to vector<1x1x128xf32>
    %34 = vector.broadcast %33 : vector<1x1x128xf32> to vector<16x16x128xf32>
    %35 = arith.mulf %30, %34 : vector<16x16x128xf32>
    %36 = arith.addf %29, %35 : vector<16x16x128xf32>
    %37 = vector.extract_strided_slice %3 {offsets = [1, 2, 0], sizes = [16, 16, 128], strides = [1, 1, 1]} : vector<18x18x128xf32> to vector<16x16x128xf32>
    %38 = vector.extract_strided_slice %0 {offsets = [1, 2, 0], sizes = [1, 1, 128], strides = [1, 1, 1]} : vector<3x3x128xf32> to vector<1x1x128xf32>
    %39 = vector.shape_cast %38 : vector<1x1x128xf32> to vector<128xf32>
    %40 = vector.shape_cast %39 : vector<128xf32> to vector<1x1x128xf32>
    %41 = vector.broadcast %40 : vector<1x1x128xf32> to vector<16x16x128xf32>
    %42 = arith.mulf %37, %41 : vector<16x16x128xf32>
    %43 = arith.addf %36, %42 : vector<16x16x128xf32>
    %44 = vector.extract_strided_slice %3 {offsets = [2, 0, 0], sizes = [16, 16, 128], strides = [1, 1, 1]} : vector<18x18x128xf32> to vector<16x16x128xf32>
    %45 = vector.extract_strided_slice %0 {offsets = [2, 0, 0], sizes = [1, 1, 128], strides = [1, 1, 1]} : vector<3x3x128xf32> to vector<1x1x128xf32>
    %46 = vector.shape_cast %45 : vector<1x1x128xf32> to vector<128xf32>
    %47 = vector.shape_cast %46 : vector<128xf32> to vector<1x1x128xf32>
    %48 = vector.broadcast %47 : vector<1x1x128xf32> to vector<16x16x128xf32>
    %49 = arith.mulf %44, %48 : vector<16x16x128xf32>
    %50 = vector.extract_strided_slice %3 {offsets = [2, 1, 0], sizes = [16, 16, 128], strides = [1, 1, 1]} : vector<18x18x128xf32> to vector<16x16x128xf32>
    %51 = vector.extract_strided_slice %0 {offsets = [2, 1, 0], sizes = [1, 1, 128], strides = [1, 1, 1]} : vector<3x3x128xf32> to vector<1x1x128xf32>
    %52 = vector.shape_cast %51 : vector<1x1x128xf32> to vector<128xf32>
    %53 = vector.shape_cast %52 : vector<128xf32> to vector<1x1x128xf32>
    %54 = vector.broadcast %53 : vector<1x1x128xf32> to vector<16x16x128xf32>
    %55 = arith.mulf %50, %54 : vector<16x16x128xf32>
    %56 = arith.addf %49, %55 : vector<16x16x128xf32>
    %57 = vector.extract_strided_slice %3 {offsets = [2, 2, 0], sizes = [16, 16, 128], strides = [1, 1, 1]} : vector<18x18x128xf32> to vector<16x16x128xf32>
    %58 = vector.extract_strided_slice %0 {offsets = [2, 2, 0], sizes = [1, 1, 128], strides = [1, 1, 1]} : vector<3x3x128xf32> to vector<1x1x128xf32>
    %59 = vector.shape_cast %58 : vector<1x1x128xf32> to vector<128xf32>
    %60 = vector.shape_cast %59 : vector<128xf32> to vector<1x1x128xf32>
    %61 = vector.broadcast %60 : vector<1x1x128xf32> to vector<16x16x128xf32>
    %62 = arith.mulf %57, %61 : vector<16x16x128xf32>
    %63 = arith.addf %56, %62 : vector<16x16x128xf32>
    %64 = arith.addf %23, %43 : vector<16x16x128xf32>
    %65 = arith.addf %64, %63 : vector<16x16x128xf32>
    %c0_6 = arith.constant 0 : index
    %c0_7 = arith.constant 0 : index
    %66 = vector.load %arg3[%c0_6, %c0_7] : memref<1x128xf32, #tpu.memory_space<vmem>>, vector<1x128xf32>
    %67 = vector.shape_cast %66 : vector<1x128xf32> to vector<128xf32>
    %68 = vector.shape_cast %67 : vector<128xf32> to vector<1x1x128xf32>
    %69 = vector.broadcast %68 : vector<1x1x128xf32> to vector<16x16x128xf32>
    %70 = arith.addf %65, %69 : vector<16x16x128xf32>
    %cst = arith.constant 0.000000e+00 : f32
    %71 = vector.broadcast %cst : f32 to vector<16x16x128xf32>
    %72 = arith.maximumf %70, %71 : vector<16x16x128xf32>
    %73 = vector.shape_cast %72 : vector<16x16x128xf32> to vector<256x128xf32>
    %74 = arith.truncf %73 : vector<256x128xf32> to vector<256x128xbf16>
    %c0_8 = arith.constant 0 : index
    %c0_9 = arith.constant 0 : index
    %75 = vector.load %arg4[%c0_8, %c0_9] : memref<128x128xbf16, #tpu.memory_space<vmem>>, vector<128x128xbf16>
    %cst_10 = arith.constant dense<0.000000e+00> : vector<256x128xf32>
    %76 = tpu.matmul %74, %75, %cst_10 {dimension_numbers = #tpu.dot_dimension_numbers<[1], [0], [0], [1], [0, 0, 1, 1], [], []>} : vector<256x128xbf16>, vector<128x128xbf16>, vector<256x128xf32> -> vector<256x128xf32>
    %c0_11 = arith.constant 0 : index
    %c0_12 = arith.constant 0 : index
    %77 = vector.load %arg5[%c0_11, %c0_12] : memref<1x128xf32, #tpu.memory_space<vmem>>, vector<1x128xf32>
    %78 = vector.shape_cast %77 : vector<1x128xf32> to vector<128xf32>
    %79 = vector.shape_cast %78 : vector<128xf32> to vector<1x128xf32>
    %80 = vector.broadcast %79 : vector<1x128xf32> to vector<256x128xf32>
    %81 = arith.addf %76, %80 : vector<256x128xf32>
    %cst_13 = arith.constant 0.000000e+00 : f32
    %82 = vector.broadcast %cst_13 : f32 to vector<256x128xf32>
    %83 = arith.maximumf %81, %82 : vector<256x128xf32>
    %84 = arith.truncf %83 : vector<256x128xf32> to vector<256x128xbf16>
    %c0_14 = arith.constant 0 : index
    %c0_15 = arith.constant 0 : index
    %c0_16 = arith.constant 0 : index
    %85 = vector.load %arg6[%c0_14, %c0_15, %c0_16] : memref<1x256x128xbf16, #tpu.memory_space<vmem>>, vector<1x256x128xbf16>
    %86 = vector.shape_cast %85 : vector<1x256x128xbf16> to vector<256x128xbf16>
    %87 = vector.shape_cast %84 : vector<256x128xbf16> to vector<1x256x128xbf16>
    tpu.vector_store %arg6[%c0_14, %c0_15, %c0_16], %87 {strides = array<i32>} : memref<1x256x128xbf16, #tpu.memory_space<vmem>>, vector<1x256x128xbf16>,
    return
  }
  func.func @transform_0(%arg0: i32) -> (i32, i32, i32, i32) {
    %c0_i32 = arith.constant 0 : i32
    %c0_i32_0 = arith.constant 0 : i32
    %c0_i32_1 = arith.constant 0 : i32
    %c0_i32_2 = arith.constant 0 : i32
    return %arg0, %c0_i32, %c0_i32_0, %c0_i32_1 : i32, i32, i32, i32
  }
  func.func @transform_1(%arg0: i32) -> (i32, i32, i32) {
    %c0_i32 = arith.constant 0 : i32
    %c0_i32_0 = arith.constant 0 : i32
    %c0_i32_1 = arith.constant 0 : i32
    %c0_i32_2 = arith.constant 0 : i32
    return %c0_i32, %c0_i32_0, %c0_i32_1 : i32, i32, i32
  }
  func.func @transform_2(%arg0: i32) -> (i32, i32) {
    %c0_i32 = arith.constant 0 : i32
    %c0_i32_0 = arith.constant 0 : i32
    %c0_i32_1 = arith.constant 0 : i32
    return %c0_i32, %c0_i32_0 : i32, i32
  }
  func.func @transform_3(%arg0: i32) -> (i32, i32) {
    %c0_i32 = arith.constant 0 : i32
    %c0_i32_0 = arith.constant 0 : i32
    %c0_i32_1 = arith.constant 0 : i32
    return %c0_i32, %c0_i32_0 : i32, i32
  }
  func.func @transform_4(%arg0: i32) -> (i32, i32) {
    %c0_i32 = arith.constant 0 : i32
    %c0_i32_0 = arith.constant 0 : i32
    %c0_i32_1 = arith.constant 0 : i32
    return %c0_i32, %c0_i32_0 : i32, i32
  }
  func.func @transform_5(%arg0: i32) -> (i32, i32, i32) {
    %c0_i32 = arith.constant 0 : i32
    %c0_i32_0 = arith.constant 0 : i32
    %c0_i32_1 = arith.constant 0 : i32
    return %arg0, %c0_i32, %c0_i32_0 : i32, i32, i32
  }
}

</mosaic_0001>

<bundles_post_ra>
// kernel: mobilenet_block.1
= control target key start
LH: loop header
LB: loop body
LE: loop exit
PB: predicated region body
PF: predicated region fallthrough
CT: control target
= control target key end

     0   :  { %s2604_s18 = smov 0   ;;  %s3894_s0 = inlined_call_operand.vmem [shape: bf16[2,18,18,128], index: 0, kind: input, shape index: {}]   ;;  %s3895_s1 = inlined_call_operand.vmem [shape: f32[3,3,128], index: 1, kind: input, shape index: {}]   ;;  %s3896_s2 = inlined_call_operand.vmem [shape: f32[1,128], index: 2, kind: input, shape index: {}]   ;;  %s3897_s3 = inlined_call_operand.vmem [shape: bf16[128,128], index: 3, kind: input, shape index: {}]   ;;  %s3898_s4 = inlined_call_operand.vmem [shape: f32[1,128], index: 4, kind: input, shape index: {}]   ;;  %s3899_s5 = inlined_call_operand.vmem [shape: bf16[2,256,128], index: 5, kind: output, shape index: {}]  }
   0x1 LB: > { %s2339_s19 = sadd.s32 4294967295, %s2572_s18   ;;  %p2343_p0 = scmp.ge.s32.totalorder %s2572_s18, 1  ;;  %s2572_s18 = sphi %s2604_s18, %s15_s18  }
   0x2   : > { %p187_p1 = scmp.lt.s32.totalorder %s2572_s18, 3 }
   0x4   : > { %p188_p2 = pnand %p2343_p0, %p187_p1 }
   0x6   : > { %191 = sbr.rel (%p188_p2) target bundleno = 488 (0x1e8), region = 40 }
   0xb   : > { %v2389_v0 = vld [vmem:[%s3897_s3 + $0x38] sm:$0xff]  ;;  %p215_p3 = scmp.lt.s32.totalorder %s2339_s19, 1  ;;  %v2388_v1 = vld [vmem:[%s3897_s3 + $0x30] sm:$0xff]  ;;  %v225_v2 = vld [vmem:[%s3895_s1] sm:$0x7]  ;;  %vm466_vm0 = vcmask 1046528  }
   0xc   : > { %2099 = vmatpush.bf16.msra.mxu0 %v2389_v0  ;;  %2529 = vmatpush.bf16.msra.mxu1 %v2389_v0  ;;  %v226_v3 = vld [vmem:[%s3895_s1 + $0x4] sm:$0x7]  ;;  %v2387_v4 = vld [vmem:[%s3897_s3 + $0x28] sm:$0xff]  ;;  %v2633_v6 = vperm.slane %v225_v2, 0  ;;  %v2635_v7 = vperm.slane %v225_v2, 1  ;;  %v2637_v8 = vperm.slane %v225_v2, 2 }
   0xd   : > { %s3957_s19 = smov (!%p215_p3, %s2339_s19), 1  ;;  %2530 = vmatpush.bf16.msra.mxu2 %v2389_v0  ;;  %2531 = vmatpush.bf16.msra.mxu3 %v2389_v0  ;;  %v227_v5 = vld [vmem:[%s3895_s1 + $0x8] sm:$0x7]  ;;  %vm708_vm1 = vcmask 1045504   ;;  %v2644_v9 = vperm.slane %v226_v3, 0  ;;  %v2646_v10 = vperm.slane %v226_v3, 1 }
   0xe   : > { %s2553_s30 = smul.u32 216, %s3957_s19  ;;  %v2648_v11 = vperm.slane %v226_v3, 2  ;;  %v2650_v12 = vperm.slane %v227_v5, 0  ;;  %v2655_v16 = vperm.slane %v227_v5, 1  ;;  %v2657_v17 = vperm.slane %v227_v5, 2  ;;  %v2386_v30 = vld [vmem:[%s3897_s3 + $0x20] sm:$0xff] }
   0xf   : > { %v2385_v47 = vld [vmem:[%s3897_s3 + $0x18] sm:$0xff]  ;;  %s2381_s6 = sshll.u32 %s3957_s19, 7 }
  0x10   : > { %2100 = vmatpush.bf16.msra.mxu0 %v2388_v1  ;;  %2532 = vmatpush.bf16.msra.mxu1 %v2388_v1  ;;  %s2642_s10 = scalar_lea.vmem %s3894_s0, %s2553_s30  ;;  %s3845_s19 = scalar_lea.vmem %s3899_s5, %s2381_s6 }
  0x11   : > { %2533 = vmatpush.bf16.msra.mxu2 %v2388_v1  ;;  %2534 = vmatpush.bf16.msra.mxu3 %v2388_v1  ;;  %v2391_v13 = vld [vmem:[%s2642_s10] sm:$0xff]   ;;  %v230_v14 = vld [vmem:[%s2642_s10 + $0x8] sm:$0x1]  ;;  %v231_v15 = vld [vmem:[%s2642_s10 + $0xc] sm:$0xff]  }
  0x12   : > { %v2392_v18 = vunpack.c.l.bf16 %v2391_v13  ;;  %v2393_v19 = vunpack.c.h.bf16 %v2391_v13  ;;  %v233_v20 = vld [vmem:[%s2642_s10 + $0x14] sm:$0x1]  ;;  %v2506_v21 = vld [vmem:[%s2642_s10 + $0x18] sm:$0xff]   ;;  %v236_v22 = vld [vmem:[%s2642_s10 + $0x20] sm:$0x1]  ;;  %v284_v23 = vunpack.c.l.bf16 %v230_v14  ;;  %v2662_v24 = vunpack.c.l.bf16 %v231_v15 }
  0x13   : > { %v2664_v25 = vunpack.c.l.bf16 %v2506_v21  ;;  %v2666_v26 = vunpack.c.h.bf16 %v2506_v21  ;;  %v2668_v27 = vunpack.c.h.bf16 %v231_v15  ;;  %v2670_v28 = vunpack.c.l.bf16 %v233_v20  ;;  %v2507_v29 = vld [vmem:[%s2642_s10 + $0x30] sm:$0xff]   ;;  %v2508_v56 = vld [vmem:[%s2642_s10 + $0x48] sm:$0xff]  }
  0x14   : > { %2101 = vmatpush.bf16.msra.mxu0 %v2387_v4  ;;  %2535 = vmatpush.bf16.msra.mxu1 %v2387_v4  ;;  %v2676_v31 = vunpack.c.l.bf16 %v236_v22  ;;  %v337_v32 = vmul.f32 %v2392_v18, %v2633_v6  ;;  %v338_v33 = vmul.f32 %v2393_v19, %v2633_v6  ;;  %v370_v34 = vmul.f32 %v2392_v18, %v2635_v7  ;;  %v2384_v1 = vld [vmem:[%s3897_s3 + $0x10] sm:$0xff] }
  0x15   : > { %2536 = vmatpush.bf16.msra.mxu2 %v2387_v4  ;;  %2537 = vmatpush.bf16.msra.mxu3 %v2387_v4  ;;  %v371_v35 = vmul.f32 %v2393_v19, %v2635_v7  ;;  %v372_v36 = vmul.f32 %v2635_v7, %v284_v23  ;;  %v612_v37 = vmul.f32 %v2392_v18, %v2637_v8  ;;  %v2684_v38 = vunpack.c.l.bf16 %v2507_v29 }
  0x16   : > { %v467_v39 = vrot.slane %v370_v34, 1  ;;  %v613_v40 = vmul.f32 %v2393_v19, %v2637_v8  ;;  %v614_v41 = vmul.f32 %v2637_v8, %v284_v23  ;;  %v854_v42 = vmul.f32 %v2644_v9, %v2662_v24 }
  0x17   : > { %v468_v43 = vrot.slane %v371_v35, 1  ;;  %v470_v44 = vrot.slane %v372_v36, 1  ;;  %v709_v45 = vrot.slane %v612_v37, 2  ;;  %v855_v46 = vmul.f32 %v2644_v9, %v2668_v27  ;;  %v242_v37 = vld [vmem:[%s2642_s10 + $0x38] sm:$0x1] }
  0x18   : > { %2102 = vmatpush.bf16.msra.mxu0 %v2386_v30  ;;  %2538 = vmatpush.bf16.msra.mxu1 %v2386_v30  ;;  %v710_v48 = vrot.slane %v613_v40, 2  ;;  %v712_v49 = vrot.slane %v614_v41, 2  ;;  %v887_v50 = vmul.f32 %v2646_v10, %v2662_v24  ;;  %v888_v51 = vmul.f32 %v2646_v10, %v2668_v27 }
  0x19   : > { %2539 = vmatpush.bf16.msra.mxu2 %v2386_v30  ;;  %2540 = vmatpush.bf16.msra.mxu3 %v2386_v30  ;;  %v469_v52 = vsel %vm466_vm0, %v467_v39, %v468_v43  ;;  %v471_v53 = vsel %vm466_vm0, %v468_v43, %v470_v44  ;;  %v889_v54 = vmul.f32 %v2646_v10, %v2670_v28  ;;  %v2703_v55 = vunpack.c.h.bf16 %v2507_v29 }
  0x1a   : > { %v579_v57 = vadd.f32 %v469_v52, %v337_v32  ;;  %v580_v58 = vadd.f32 %v471_v53, %v338_v33  ;;  %v711_v59 = vsel %vm708_vm1, %v709_v45, %v710_v48  ;;  %v713_v60 = vsel %vm708_vm1, %v710_v48, %v712_v49  ;;  %v2383_v33 = vld [vmem:[%s3897_s3 + $0x8] sm:$0xff]  ;;  %v243_v48 = vld [vmem:[%s2642_s10 + $0x3c] sm:$0xff]   ;;  %v245_v52 = vld [vmem:[%s2642_s10 + $0x44] sm:$0x1] }
  0x1b   : > { %v983_v61 = vrot.slane %v887_v50, 1  ;;  %v984_v62 = vrot.slane %v888_v51, 1  ;;  %v986_v63 = vrot.slane %v889_v54, 1  ;;  %v1128_v0 = vmul.f32 %v2648_v11, %v2662_v24  ;;  %v248_v53 = vld [vmem:[%s2642_s10 + $0x50] sm:$0x1] }
  0x1c   : > { %2103 = vmatpush.bf16.msra.mxu0 %v2385_v47  ;;  %2541 = vmatpush.bf16.msra.mxu1 %v2385_v47  ;;  %v821_v2 = vadd.f32 %v711_v59, %v579_v57  ;;  %v822_v3 = vadd.f32 %v713_v60, %v580_v58  ;;  %v1129_v4 = vmul.f32 %v2648_v11, %v2668_v27  ;;  %v2715_v5 = vunpack.c.l.bf16 %v2508_v56 }
  0x1d   : > { %2542 = vmatpush.bf16.msra.mxu2 %v2385_v47  ;;  %2543 = vmatpush.bf16.msra.mxu3 %v2385_v47  ;;  %v985_v13 = vsel %vm466_vm0, %v983_v61, %v984_v62  ;;  %v987_v14 = vsel %vm466_vm0, %v984_v62, %v986_v63  ;;  %v1130_v15 = vmul.f32 %v2648_v11, %v2670_v28  ;;  %v1224_v18 = vrot.slane %v1128_v0, 2 }
  0x1e   : > { %v1095_v19 = vadd.f32 %v985_v13, %v854_v42  ;;  %v1096_v20 = vadd.f32 %v987_v14, %v855_v46  ;;  %v1225_v21 = vrot.slane %v1129_v4, 2  ;;  %v1369_v22 = vmul.f32 %v2664_v25, %v2650_v12 }
  0x1f   : > { %v1227_v23 = vrot.slane %v1130_v15, 2  ;;  %v1370_v29 = vmul.f32 %v2666_v26, %v2650_v12  ;;  %v1402_v30 = vmul.f32 %v2664_v25, %v2655_v16  ;;  %v1403_v32 = vmul.f32 %v2666_v26, %v2655_v16 }
  0x20   : > { %2104 = vmatpush.bf16.msra.mxu0 %v2384_v1  ;;  %2544 = vmatpush.bf16.msra.mxu1 %v2384_v1  ;;  %v1226_v34 = vsel %vm708_vm1, %v1224_v18, %v1225_v21  ;;  %v1404_v35 = vmul.f32 %v2655_v16, %v2676_v31  ;;  %v1643_v36 = vmul.f32 %v2664_v25, %v2657_v17  ;;  %v2738_v39 = vunpack.c.h.bf16 %v2508_v56  ;;  %v2382_v56 = vld [vmem:[%s3897_s3] sm:$0xff] }
  0x21   : > { %2545 = vmatpush.bf16.msra.mxu2 %v2384_v1  ;;  %2546 = vmatpush.bf16.msra.mxu3 %v2384_v1  ;;  %v1228_v40 = vsel %vm708_vm1, %v1225_v21, %v1227_v23  ;;  %v1336_v41 = vadd.f32 %v1226_v34, %v1095_v19  ;;  %v1498_v42 = vrot.slane %v1402_v30, 1  ;;  %v1499_v43 = vrot.slane %v1403_v32, 1  ;;  %v2509_v1 = vld [vmem:[%s2642_s10 + $0x60] sm:$0xff]  }
  0x22   : > { %v1337_v44 = vadd.f32 %v1228_v40, %v1096_v20  ;;  %v1501_v45 = vrot.slane %v1404_v35, 1  ;;  %v1644_v46 = vmul.f32 %v2666_v26, %v2657_v17  ;;  %v1645_v47 = vmul.f32 %v2657_v17, %v2676_v31  ;;  %v2769_v19 = vld [vmem:[%s3896_s2] ss:$0 sm:$0xff] }
  0x23   : > { %v1500_v49 = vsel %vm466_vm0, %v1498_v42, %v1499_v43  ;;  %v1739_v50 = vrot.slane %v1643_v36, 2  ;;  %v1883_v51 = vadd.f32 %v1336_v41, %v821_v2  ;;  %v2749_v54 = vunpack.c.l.bf16 %v242_v37 }
  0x24   : > { %2105 = vmatpush.bf16.msra.mxu0 %v2383_v33  ;;  %2547 = vmatpush.bf16.msra.mxu1 %v2383_v33  ;;  %v1502_v57 = vsel %vm466_vm0, %v1499_v43, %v1501_v45  ;;  %v1610_v58 = vadd.f32 %v1500_v49, %v1369_v22  ;;  %v1740_v59 = vrot.slane %v1644_v46, 2  ;;  %v1742_v60 = vrot.slane %v1645_v47, 2 }
  0x25   : > { %3928 = vst [vmem:[#allocation2_spill] sm:$0xff] %v2749_v54  ;;  %2548 = vmatpush.bf16.msra.mxu2 %v2383_v33  ;;  %2549 = vmatpush.bf16.msra.mxu3 %v2383_v33  ;;  %v1611_v61 = vadd.f32 %v1502_v57, %v1370_v29  ;;  %v1884_v62 = vadd.f32 %v1337_v44, %v822_v3  ;;  %v2755_v63 = vunpack.c.l.bf16 %v243_v48  ;;  %v2757_v0 = vunpack.c.h.bf16 %v243_v48 }
  0x26   : > { %v1741_v2 = vsel %vm708_vm1, %v1739_v50, %v1740_v59  ;;  %v1743_v4 = vsel %vm708_vm1, %v1740_v59, %v1742_v60  ;;  %v2762_v13 = vunpack.c.l.bf16 %v245_v52  ;;  %v2764_v14 = vunpack.c.l.bf16 %v248_v53 }
  0x27   : > { %3929 = vst [vmem:[#allocation3_spill] sm:$0xff] %v2755_v63  ;;  %v1851_v15 = vadd.f32 %v1741_v2, %v1610_v58  ;;  %v1852_v18 = vadd.f32 %v1743_v4, %v1611_v61  ;;  %v345_v3 = vmul.f32 %v2684_v38, %v2633_v6  ;;  %v346_v20 = vmul.f32 %v2703_v55, %v2633_v6 }
  0x28   : > { %3930 = vst [vmem:[#allocation4_spill] sm:$0xff] %v2757_v0  ;;  %2106 = vmatpush.bf16.msra.mxu0 %v2382_v56  ;;  %2550 = vmatpush.bf16.msra.mxu1 %v2382_v56  ;;  %v382_v21 = vmul.f32 %v2684_v38, %v2635_v7  ;;  %v383_v22 = vmul.f32 %v2703_v55, %v2635_v7  ;;  %v2781_v29 = vunpack.c.l.bf16 %v2509_v1  ;;  %v2785_v34 = vunpack.c.h.bf16 %v2509_v1 }
  0x29   : > { %3931 = vst [vmem:[#allocation5_spill] sm:$0xff] %v2762_v13  ;;  %v384_v23 = vmul.f32 %v2635_v7, %v2749_v54  ;;  %2551 = vmatpush.bf16.msra.mxu2 %v2382_v56  ;;  %2552 = vmatpush.bf16.msra.mxu3 %v2382_v56  ;;  %v1915_v30 = vadd.f32 %v1883_v51, %v1851_v15 }
  0x2a   : > { %3932 = vst [vmem:[#allocation6_spill] sm:$0xff] %v2781_v29  ;;  %v1916_v32 = vadd.f32 %v1884_v62, %v1852_v18  ;;  %v624_v33 = vmul.f32 %v2684_v38, %v2637_v8  ;;  %v487_v35 = vrot.slane %v382_v21, 1  ;;  %v488_v36 = vrot.slane %v383_v22, 1 }
  0x2b   : > { %3933 = vst [vmem:[#allocation7_spill] sm:$0xff] %v2785_v34  ;;  %v490_v37 = vrot.slane %v384_v23, 1  ;;  %v625_v40 = vmul.f32 %v2703_v55, %v2637_v8  ;;  %v1951_v41 = vadd.f32 %v2769_v19, %v1915_v30  ;;  %v626_v43 = vmul.f32 %v2637_v8, %v2749_v54 }
  0x2c   : > { %v1952_v42 = vadd.f32 %v2769_v19, %v1916_v32  ;;  %v729_v44 = vrot.slane %v624_v33, 2  ;;  %v489_v45 = vsel %vm466_vm0, %v487_v35, %v488_v36  ;;  %v862_v48 = vmul.f32 %v2644_v9, %v2755_v63 }
  0x2d   : > { %v491_v46 = vsel %vm466_vm0, %v488_v36, %v490_v37  ;;  %v730_v47 = vrot.slane %v625_v40, 2  ;;  %v1983_v49 = vmax.f32 %v1951_v41, 0.0  ;;  %v587_v51 = vadd.f32 %v489_v45, %v345_v3 }
  0x2e   : > { %v1984_v50 = vmax.f32 %v1952_v42, 0.0  ;;  %v588_v52 = vadd.f32 %v491_v46, %v346_v20  ;;  %v732_v56 = vrot.slane %v626_v43, 2  ;;  %v863_v57 = vmul.f32 %v2644_v9, %v2757_v0 }
  0x2f   : > { %v731_v53 = vsel %vm708_vm1, %v729_v44, %v730_v47  ;;  %v899_v58 = vmul.f32 %v2646_v10, %v2755_v63  ;;  %v900_v61 = vmul.f32 %v2646_v10, %v2757_v0  ;;  %v901_v62 = vmul.f32 %v2646_v10, %v2762_v13  ;;  %v2510_v44 = vld [vmem:[%s2642_s10 + $0x78] sm:$0xff]  }
  0x30   : > { %v2015_v59 = vpack.c.bf16 %v1984_v50, %v1983_v49  ;;  %v829_v60 = vadd.f32 %v731_v53, %v587_v51  ;;  %v733_v1 = vsel %vm708_vm1, %v730_v47, %v732_v56  ;;  %v1140_v4 = vmul.f32 %v2648_v11, %v2755_v63 }
  0x31   : > { %v1003_v2 = vrot.slane %v899_v58, 1  ;;  %v1141_v15 = vmul.f32 %v2648_v11, %v2757_v0  ;;  %v830_v18 = vadd.f32 %v733_v1, %v588_v52  ;;  %v1004_v3 = vrot.slane %v900_v61, 1  ;;  %v254_v58 = vld [vmem:[%s2642_s10 + $0x68] sm:$0x1] }
  0x32   : > { %2107 = vmatmul.bf16.vlgmr.msra.gmra.mxu0 %v2015_v59  ;;  %v1006_v20 = vrot.slane %v901_v62, 1  ;;  %v1142_v21 = vmul.f32 %v2648_v11, %v2762_v13  ;;  %v1244_v22 = vrot.slane %v1140_v4, 2  ;;  %v1377_v30 = vmul.f32 %v2715_v5, %v2650_v12  ;;  %v255_v59 = vld [vmem:[%s2642_s10 + $0x6c] sm:$0xff]  }
  0x33   : > { %v1245_v23 = vrot.slane %v1141_v15, 2  ;;  %v1378_v32 = vmul.f32 %v2738_v39, %v2650_v12  ;;  %v1005_v33 = vsel %vm466_vm0, %v1003_v2, %v1004_v3  ;;  %v1414_v37 = vmul.f32 %v2715_v5, %v2655_v16  ;;  %v257_v15 = vld [vmem:[%s2642_s10 + $0x74] sm:$0x1] }
  0x34   : > { %v1007_v35 = vsel %vm466_vm0, %v1004_v3, %v1006_v20  ;;  %v1247_v36 = vrot.slane %v1142_v21, 2  ;;  %v1103_v40 = vadd.f32 %v1005_v33, %v862_v48  ;;  %v1415_v43 = vmul.f32 %v2738_v39, %v2655_v16 }
  0x35   : > { %v1104_v41 = vadd.f32 %v1007_v35, %v863_v57  ;;  %v1246_v42 = vsel %vm708_vm1, %v1244_v22, %v1245_v23  ;;  %v1416_v46 = vmul.f32 %v2655_v16, %v2764_v14  ;;  %v1518_v47 = vrot.slane %v1414_v37, 1 }
  0x36   : > { %v1248_v45 = vsel %vm708_vm1, %v1245_v23, %v1247_v36  ;;  %v1655_v49 = vmul.f32 %v2715_v5, %v2657_v17  ;;  %v1344_v48 = vadd.f32 %v1246_v42, %v1103_v40  ;;  %v1519_v51 = vrot.slane %v1415_v43, 1  ;;  %v260_v23 = vld [vmem:[%s2642_s10 + $0x80] sm:$0x1] }
  0x37   : > { %v1345_v50 = vadd.f32 %v1248_v45, %v1104_v41  ;;  %v1656_v52 = vmul.f32 %v2738_v39, %v2657_v17  ;;  %v1521_v53 = vrot.slane %v1416_v46, 1  ;;  %v1657_v56 = vmul.f32 %v2657_v17, %v2764_v14 }
  0x38   : > { %v1759_v57 = vrot.slane %v1655_v49, 2  ;;  %v2836_v61 = vunpack.c.l.bf16 %v2510_v44  ;;  %v1520_v62 = vsel %vm466_vm0, %v1518_v47, %v1519_v51  ;;  %v1891_v2 = vadd.f32 %v1344_v48, %v829_v60 }
  0x39   : > { %v1760_v1 = vrot.slane %v1656_v52, 2  ;;  %v1892_v4 = vadd.f32 %v1345_v50, %v830_v18  ;;  %v1522_v3 = vsel %vm466_vm0, %v1519_v51, %v1521_v53  ;;  %v1618_v20 = vadd.f32 %v1520_v62, %v1377_v30 }
  0x3a   : > { %v1762_v21 = vrot.slane %v1657_v56, 2  ;;  %v2841_v22 = vunpack.c.h.bf16 %v2510_v44  ;;  %v1619_v33 = vadd.f32 %v1522_v3, %v1378_v32  ;;  %v2845_v36 = vunpack.c.l.bf16 %v254_v58 }
  0x3b   : > { %v1761_v35 = vsel %vm708_vm1, %v1759_v57, %v1760_v1  ;;  %v2847_v37 = vunpack.c.l.bf16 %v255_v59  ;;  %v2850_v60 = vunpack.c.h.bf16 %v255_v59  ;;  %v2852_v18 = vunpack.c.l.bf16 %v257_v15 }
  0x3c   : > { %3934 = vst [vmem:[#allocation8_spill] sm:$0xff] %v2845_v36  ;;  %v1763_v40 = vsel %vm708_vm1, %v1760_v1, %v1762_v21  ;;  %v1859_v41 = vadd.f32 %v1761_v35, %v1618_v20  ;;  %v2854_v30 = vunpack.c.l.bf16 %v260_v23  ;;  %v353_v43 = vmul.f32 %v2781_v29, %v2633_v6 }
  0x3d   : > { %3935 = vst [vmem:[#allocation9_spill] sm:$0xff] %v2850_v60  ;;  %v1860_v42 = vadd.f32 %v1763_v40, %v1619_v33  ;;  %v354_v32 = vmul.f32 %v2785_v34, %v2633_v6  ;;  %v394_v45 = vmul.f32 %v2781_v29, %v2635_v7  ;;  %v395_v46 = vmul.f32 %v2785_v34, %v2635_v7 }
  0x3e   : > { %3936 = vst [vmem:[#allocation10_spill] sm:$0xff] %v2852_v18  ;;  %v1923_v44 = vadd.f32 %v1891_v2, %v1859_v41  ;;  %v396_v47 = vmul.f32 %v2635_v7, %v2845_v36  ;;  %v636_v48 = vmul.f32 %v2781_v29, %v2637_v8  ;;  %v637_v50 = vmul.f32 %v2785_v34, %v2637_v8 }
  0x3f   : > { %v1924_v49 = vadd.f32 %v1892_v4, %v1860_v42  ;;  %v638_v51 = vmul.f32 %v2637_v8, %v2845_v36  ;;  %v507_v53 = vrot.slane %v394_v45, 1  ;;  %v508_v56 = vrot.slane %v395_v46, 1 }
  0x40   : > { %v1959_v52 = vadd.f32 %v2769_v19, %v1923_v44  ;;  %v510_v57 = vrot.slane %v396_v47, 1  ;;  %v749_v59 = vrot.slane %v636_v48, 2  ;;  %v750_v62 = vrot.slane %v637_v50, 2 }
  0x41   : > { %v1960_v58 = vadd.f32 %v2769_v19, %v1924_v49  ;;  %v752_v1 = vrot.slane %v638_v51, 2  ;;  %v509_v4 = vsel %vm466_vm0, %v507_v53, %v508_v56  ;;  %v870_v3 = vmul.f32 %v2644_v9, %v2847_v37 }
  0x42   : > { %v1991_v2 = vmax.f32 %v1959_v52, 0.0  ;;  %v511_v15 = vsel %vm466_vm0, %v508_v56, %v510_v57  ;;  %v595_v21 = vadd.f32 %v509_v4, %v353_v43  ;;  %v751_v33 = vsel %vm708_vm1, %v749_v59, %v750_v62 }
  0x43   : > { %v1992_v20 = vmax.f32 %v1960_v58, 0.0  ;;  %v596_v23 = vadd.f32 %v511_v15, %v354_v32  ;;  %v753_v35 = vsel %vm708_vm1, %v750_v62, %v752_v1  ;;  %v871_v40 = vmul.f32 %v2644_v9, %v2850_v60 }
  0x44   : > { %v911_v41 = vmul.f32 %v2646_v10, %v2847_v37  ;;  %v912_v42 = vmul.f32 %v2646_v10, %v2850_v60  ;;  %v837_v45 = vadd.f32 %v751_v33, %v595_v21  ;;  %v913_v43 = vmul.f32 %v2646_v10, %v2852_v18  ;;  %v2511_v33 = vld [vmem:[%s2642_s10 + $0x90] sm:$0xff]  }
  0x45   : > { %v2019_v44 = vpack.c.bf16 %v1992_v20, %v1991_v2  ;;  %v838_v46 = vadd.f32 %v753_v35, %v596_v23  ;;  %v1152_v49 = vmul.f32 %v2648_v11, %v2847_v37  ;;  %v1153_v48 = vmul.f32 %v2648_v11, %v2850_v60 }
  0x46   : > { %v1023_v32 = vrot.slane %v911_v41, 1  ;;  %v1024_v47 = vrot.slane %v912_v42, 1  ;;  %v1026_v50 = vrot.slane %v913_v43, 1  ;;  %v1154_v51 = vmul.f32 %v2648_v11, %v2852_v18 }
  0x47   : > { %2127 = vmatmul.bf16.vlgmr.msra.gmra.mxu1 %v2019_v44  ;;  %v1385_v52 = vmul.f32 %v2836_v61, %v2650_v12  ;;  %v1386_v53 = vmul.f32 %v2841_v22, %v2650_v12  ;;  %v1264_v57 = vrot.slane %v1152_v49, 2  ;;  %v1265_v58 = vrot.slane %v1153_v48, 2 }
  0x48   : > { %v1025_v56 = vsel %vm466_vm0, %v1023_v32, %v1024_v47  ;;  %v1426_v59 = vmul.f32 %v2836_v61, %v2655_v16  ;;  %v1027_v62 = vsel %vm466_vm0, %v1024_v47, %v1026_v50  ;;  %v1267_v2 = vrot.slane %v1154_v51, 2  ;;  %v2512_v47 = vld [vmem:[%s2642_s10 + $0xa8] sm:$0xff]  }
  0x49   : > { %v1111_v1 = vadd.f32 %v1025_v56, %v870_v3  ;;  %v1427_v4 = vmul.f32 %v2841_v22, %v2655_v16  ;;  %v1112_v15 = vadd.f32 %v1027_v62, %v871_v40  ;;  %v1266_v20 = vsel %vm708_vm1, %v1264_v57, %v1265_v58  ;;  %v266_v56 = vld [vmem:[%s2642_s10 + $0x98] sm:$0x1] }
  0x4a   : > { %v1428_v21 = vmul.f32 %v2655_v16, %v2854_v30  ;;  %v1538_v23 = vrot.slane %v1426_v59, 1  ;;  %v1268_v35 = vsel %vm708_vm1, %v1265_v58, %v1267_v2  ;;  %v1667_v3 = vmul.f32 %v2836_v61, %v2657_v17 }
  0x4b   : > { %v1352_v41 = vadd.f32 %v1266_v20, %v1111_v1  ;;  %v1539_v42 = vrot.slane %v1427_v4, 1  ;;  %v1353_v44 = vadd.f32 %v1268_v35, %v1112_v15  ;;  %v1668_v40 = vmul.f32 %v2841_v22, %v2657_v17  ;;  %v267_v1 = vld [vmem:[%s2642_s10 + $0x9c] sm:$0xff]   ;;  %v269_v20 = vld [vmem:[%s2642_s10 + $0xa4] sm:$0x1]  ;;  %v272_v35 = vld [vmem:[%s2642_s10 + $0xb0] sm:$0x1] }
  0x4c   : > { %v1541_v43 = vrot.slane %v1428_v21, 1  ;;  %v1669_v32 = vmul.f32 %v2657_v17, %v2854_v30  ;;  %v1779_v48 = vrot.slane %v1667_v3, 2  ;;  %v2917_v51 = vunpack.c.l.bf16 %v2511_v33 }
  0x4d   : > { %v1540_v49 = vsel %vm466_vm0, %v1538_v23, %v1539_v42  ;;  %v1899_v50 = vadd.f32 %v1352_v41, %v837_v45  ;;  %v1780_v59 = vrot.slane %v1668_v40, 2  ;;  %v1900_v4 = vadd.f32 %v1353_v44, %v838_v46 }
  0x4e   : > { %3937 = vst [vmem:[#allocation11_spill] sm:$0xff] %v2917_v51  ;;  %v1542_v57 = vsel %vm466_vm0, %v1539_v42, %v1541_v43  ;;  %v1626_v58 = vadd.f32 %v1540_v49, %v1385_v52  ;;  %v1782_v62 = vrot.slane %v1669_v32, 2  ;;  %v2922_v15 = vunpack.c.h.bf16 %v2511_v33 }
  0x4f   : > { %v1627_v2 = vadd.f32 %v1542_v57, %v1386_v53  ;;  %v2925_v21 = vunpack.c.l.bf16 %v2512_v47  ;;  %v1781_v23 = vsel %vm708_vm1, %v1779_v48, %v1780_v59  ;;  %v2930_v41 = vunpack.c.h.bf16 %v2512_v47 }
  0x50   : > { %3938 = vst [vmem:[#allocation12_spill] sm:$0xff] %v2922_v15  ;;  %v1783_v45 = vsel %vm708_vm1, %v1780_v59, %v1782_v62  ;;  %v2932_v3 = vunpack.c.l.bf16 %v266_v56  ;;  %v1867_v52 = vadd.f32 %v1781_v23, %v1626_v58  ;;  %v2934_v43 = vunpack.c.l.bf16 %v267_v1 }
  0x51   : > { %v1868_v42 = vadd.f32 %v1783_v45, %v1627_v2  ;;  %v2936_v53 = vunpack.c.h.bf16 %v267_v1  ;;  %v2938_v46 = vunpack.c.l.bf16 %v269_v20  ;;  %v2940_v33 = vunpack.c.l.bf16 %v272_v35 }
  0x52   : > { %3939 = vst [vmem:[#allocation13_spill] sm:$0xff] %v2932_v3  ;;  %v361_v44 = vmul.f32 %v2917_v51, %v2633_v6  ;;  %v362_v40 = vmul.f32 %v2922_v15, %v2633_v6  ;;  %v1931_v32 = vadd.f32 %v1899_v50, %v1867_v52  ;;  %v406_v49 = vmul.f32 %v2917_v51, %v2635_v7 }
  0x53   : > { %3940 = vst [vmem:[#allocation14_spill] sm:$0xff] %v2936_v53  ;;  %v1932_v47 = vadd.f32 %v1900_v4, %v1868_v42  ;;  %v407_v48 = vmul.f32 %v2922_v15, %v2635_v7  ;;  %v408_v56 = vmul.f32 %v2635_v7, %v2932_v3  ;;  %v648_v57 = vmul.f32 %v2917_v51, %v2637_v8 }
  0x54   : > { %3941 = vst [vmem:[#allocation15_spill] sm:$0xff] %v2938_v46  ;;  %v649_v58 = vmul.f32 %v2922_v15, %v2637_v8  ;;  %v650_v59 = vmul.f32 %v2637_v8, %v2932_v3  ;;  %v1967_v50 = vadd.f32 %v2769_v19, %v1931_v32  ;;  %v527_v1 = vrot.slane %v406_v49, 1 }
  0x55   : > { %v1968_v62 = vadd.f32 %v2769_v19, %v1932_v47  ;;  %v528_v2 = vrot.slane %v407_v48, 1  ;;  %v530_v4 = vrot.slane %v408_v56, 1  ;;  %v769_v20 = vrot.slane %v648_v57, 2 }
  0x56   : > { %v770_v35 = vrot.slane %v649_v58, 2  ;;  %v772_v23 = vrot.slane %v650_v59, 2  ;;  %v1999_v45 = vmax.f32 %v1967_v50, 0.0  ;;  %v878_v15 = vmul.f32 %v2644_v9, %v2934_v43 }
  0x57   : > { %v2000_v52 = vmax.f32 %v1968_v62, 0.0  ;;  %v529_v42 = vsel %vm466_vm0, %v527_v1, %v528_v2  ;;  %v531_v51 = vsel %vm466_vm0, %v528_v2, %v530_v4  ;;  %v879_v56 = vmul.f32 %v2644_v9, %v2936_v53 }
  0x58   : > { %v603_v3 = vadd.f32 %v529_v42, %v361_v44  ;;  %v771_v32 = vsel %vm708_vm1, %v769_v20, %v770_v35  ;;  %v773_v47 = vsel %vm708_vm1, %v770_v35, %v772_v23  ;;  %v604_v48 = vadd.f32 %v531_v51, %v362_v40 }
  0x59   : > { %v2023_v49 = vpack.c.bf16 %v2000_v52, %v1999_v45  ;;  %v923_v57 = vmul.f32 %v2646_v10, %v2934_v43  ;;  %v924_v59 = vmul.f32 %v2646_v10, %v2936_v53  ;;  %v925_v50 = vmul.f32 %v2646_v10, %v2938_v46 }
  0x5a   : > { %v845_v58 = vadd.f32 %v771_v32, %v603_v3  ;;  %v1164_v44 = vmul.f32 %v2648_v11, %v2934_v43  ;;  %v846_v62 = vadd.f32 %v773_v47, %v604_v48  ;;  %v1165_v51 = vmul.f32 %v2648_v11, %v2936_v53 }
  0x5b   : > { %2147 = vmatmul.bf16.vlgmr.msra.gmra.mxu2 %v2023_v49  ;;  %v1043_v1 = vrot.slane %v923_v57, 1  ;;  %v1166_v40 = vmul.f32 %v2648_v11, %v2938_v46  ;;  %v1044_v2 = vrot.slane %v924_v59, 1  ;;  %v1046_v3 = vrot.slane %v925_v50, 1 }
  0x5c   : > { %v1284_v4 = vrot.slane %v1164_v44, 2  ;;  %v1393_v20 = vmul.f32 %v2925_v21, %v2650_v12  ;;  %v1285_v35 = vrot.slane %v1165_v51, 2  ;;  %v1394_v45 = vmul.f32 %v2930_v41, %v2650_v12  ;;  %v237_v44 = vld [vmem:[%s2642_s10 + $0x24] sm:$0xff]  }
  0x5d   : > { %v1287_v23 = vrot.slane %v1166_v40, 2  ;;  %v1438_v52 = vmul.f32 %v2925_v21, %v2655_v16  ;;  %v1045_v42 = vsel %vm466_vm0, %v1043_v1, %v1044_v2  ;;  %v1047_v32 = vsel %vm466_vm0, %v1044_v2, %v1046_v3 }
  0x5e   : > { %v1439_v47 = vmul.f32 %v2930_v41, %v2655_v16  ;;  %v1440_v49 = vmul.f32 %v2655_v16, %v2940_v33  ;;  %v1119_v48 = vadd.f32 %v1045_v42, %v878_v15  ;;  %v1120_v57 = vadd.f32 %v1047_v32, %v879_v56  ;;  %v239_v56 = vld [vmem:[%s2642_s10 + $0x2c] sm:$0x1] }
  0x5f   : > { %v1286_v59 = vsel %vm708_vm1, %v1284_v4, %v1285_v35  ;;  %v1288_v50 = vsel %vm708_vm1, %v1285_v35, %v1287_v23  ;;  %v1558_v51 = vrot.slane %v1438_v52, 1  ;;  %v1679_v1 = vmul.f32 %v2925_v21, %v2657_v17 }
  0x60   : > { %v1559_v40 = vrot.slane %v1439_v47, 1  ;;  %v1561_v36 = vrot.slane %v1440_v49, 1  ;;  %v1360_v2 = vadd.f32 %v1286_v59, %v1119_v48  ;;  %v1361_v3 = vadd.f32 %v1288_v50, %v1120_v57 }
  0x61   : > { %v1680_v34 = vmul.f32 %v2930_v41, %v2657_v17  ;;  %v1681_v15 = vmul.f32 %v2657_v17, %v2940_v33  ;;  %v1799_v23 = vrot.slane %v1679_v1, 2  ;;  %v3004_v52 = vunpack.c.l.bf16 %v237_v44 }
  0x62   : > { %v1560_v4 = vsel %vm466_vm0, %v1558_v51, %v1559_v40  ;;  %v1562_v35 = vsel %vm466_vm0, %v1559_v40, %v1561_v36  ;;  %v1907_v48 = vadd.f32 %v1360_v2, %v845_v58  ;;  %v1908_v57 = vadd.f32 %v1361_v3, %v846_v62 }
  0x63   : > { %v1634_v42 = vadd.f32 %v1560_v4, %v1393_v20  ;;  %v1635_v32 = vadd.f32 %v1562_v35, %v1394_v45  ;;  %v1800_v47 = vrot.slane %v1680_v34, 2  ;;  %v1802_v49 = vrot.slane %v1681_v15, 2 }
  0x64   : > { %v3006_v59 = vunpack.c.h.bf16 %v237_v44  ;;  %v3008_v50 = vunpack.c.l.bf16 %v239_v56  ;;  %v339_v36 = vmul.f32 %v2633_v6, %v2662_v24  ;;  %v340_v51 = vmul.f32 %v2633_v6, %v2668_v27 }
  0x65   : > { %v1801_v29 = vsel %vm708_vm1, %v1799_v23, %v1800_v47  ;;  %v1803_v54 = vsel %vm708_vm1, %v1800_v47, %v1802_v49  ;;  %v373_v34 = vmul.f32 %v2635_v7, %v2662_v24  ;;  %v374_v58 = vmul.f32 %v2635_v7, %v2668_v27 }
  0x66   : > { %v1875_v20 = vadd.f32 %v1801_v29, %v1634_v42  ;;  %v1876_v45 = vadd.f32 %v1803_v54, %v1635_v32  ;;  %v375_v62 = vmul.f32 %v2635_v7, %v2670_v28  ;;  %v615_v44 = vmul.f32 %v2637_v8, %v2662_v24 }
  0x67   : > { %v616_v40 = vmul.f32 %v2637_v8, %v2668_v27  ;;  %v617_v1 = vmul.f32 %v2637_v8, %v2670_v28  ;;  %v472_v2 = vrot.slane %v373_v34, 1  ;;  %v473_v3 = vrot.slane %v374_v58, 1 }
  0x68   : > { %v1939_v29 = vadd.f32 %v1907_v48, %v1875_v20  ;;  %v1940_v54 = vadd.f32 %v1908_v57, %v1876_v45  ;;  %v475_v15 = vrot.slane %v375_v62, 1  ;;  %v714_v56 = vrot.slane %v615_v44, 2 }
  0x69   : > { %v715_v4 = vrot.slane %v616_v40, 2  ;;  %v717_v35 = vrot.slane %v617_v1, 2  ;;  %v474_v24 = vsel %vm466_vm0, %v472_v2, %v473_v3  ;;  %v856_v27 = vmul.f32 %v2664_v25, %v2644_v9 }
  0x6a   : > { %v1975_v23 = vadd.f32 %v2769_v19, %v1939_v29  ;;  %v1976_v42 = vadd.f32 %v2769_v19, %v1940_v54  ;;  %v476_v32 = vsel %vm466_vm0, %v473_v3, %v475_v15  ;;  %v581_v28 = vadd.f32 %v474_v24, %v339_v36 }
  0x6b   : > { %v716_v47 = vsel %vm708_vm1, %v714_v56, %v715_v4  ;;  %v718_v49 = vsel %vm708_vm1, %v715_v4, %v717_v35  ;;  %v582_v20 = vadd.f32 %v476_v32, %v340_v51  ;;  %v857_v45 = vmul.f32 %v2666_v26, %v2644_v9 }
  0x6c   : > { %v2007_v48 = vmax.f32 %v1975_v23, 0.0  ;;  %v2008_v57 = vmax.f32 %v1976_v42, 0.0  ;;  %v823_v34 = vadd.f32 %v716_v47, %v581_v28  ;;  %v890_v58 = vmul.f32 %v2664_v25, %v2646_v10 }
  0x6d   : > { %v891_v62 = vmul.f32 %v2666_v26, %v2646_v10  ;;  %v892_v36 = vmul.f32 %v2646_v10, %v2676_v31  ;;  %v824_v40 = vadd.f32 %v718_v49, %v582_v20  ;;  %v1131_v1 = vmul.f32 %v2664_v25, %v2648_v11 }
  0x6e   : > { %v2027_v44 = vpack.c.bf16 %v2008_v57, %v2007_v48  ;;  %v1132_v51 = vmul.f32 %v2666_v26, %v2648_v11  ;;  %v988_v29 = vrot.slane %v890_v58, 1  ;;  %v1133_v3 = vmul.f32 %v2648_v11, %v2676_v31  ;;  %v249_v57 = vld [vmem:[%s2642_s10 + $0x54] sm:$0xff]  }
  0x6f   : > { %v989_v54 = vrot.slane %v891_v62, 1  ;;  %v991_v2 = vrot.slane %v892_v36, 1  ;;  %v1229_v15 = vrot.slane %v1131_v1, 2  ;;  %v1371_v4 = vmul.f32 %v2650_v12, %v3004_v52 }
  0x70   : > { %2167 = vmatmul.bf16.vlgmr.msra.gmra.mxu3 %v2027_v44  ;;  %v1230_v56 = vrot.slane %v1132_v51, 2  ;;  %v1372_v35 = vmul.f32 %v2650_v12, %v3006_v59  ;;  %v1232_v24 = vrot.slane %v1133_v3, 2  ;;  %v1405_v32 = vmul.f32 %v2655_v16, %v3004_v52 }
  0x71   : > { %v990_v23 = vsel %vm466_vm0, %v988_v29, %v989_v54  ;;  %v992_v42 = vsel %vm466_vm0, %v989_v54, %v991_v2  ;;  %v1406_v48 = vmul.f32 %v2655_v16, %v3006_v59  ;;  %v1407_v58 = vmul.f32 %v2655_v16, %v3008_v50  ;;  %v251_v2 = vld [vmem:[%s2642_s10 + $0x5c] sm:$0x1] }
  0x72   : > { %v1097_v28 = vadd.f32 %v990_v23, %v856_v27  ;;  %v1098_v47 = vadd.f32 %v992_v42, %v857_v45  ;;  %v1231_v49 = vsel %vm708_vm1, %v1229_v15, %v1230_v56  ;;  %v1233_v20 = vsel %vm708_vm1, %v1230_v56, %v1232_v24 }
  0x73   : > { %v1503_v62 = vrot.slane %v1405_v32, 1  ;;  %v1646_v36 = vmul.f32 %v2657_v17, %v3004_v52  ;;  %v1504_v27 = vrot.slane %v1406_v48, 1  ;;  %v1647_v45 = vmul.f32 %v2657_v17, %v3006_v59 }
  0x74   : > { %v1338_v44 = vadd.f32 %v1231_v49, %v1097_v28  ;;  %v1339_v1 = vadd.f32 %v1233_v20, %v1098_v47  ;;  %v1506_v51 = vrot.slane %v1407_v58, 1  ;;  %v1648_v29 = vmul.f32 %v2657_v17, %v3008_v50 }
  0x75   : > { %v1744_v54 = vrot.slane %v1646_v36, 2  ;;  %v3072_v3 = vunpack.c.l.bf16 %v249_v57  ;;  %v1505_v15 = vsel %vm466_vm0, %v1503_v62, %v1504_v27  ;;  %v1745_v56 = vrot.slane %v1647_v45, 2 }
  0x76   : > { %v1885_v23 = vadd.f32 %v1338_v44, %v823_v34  ;;  %v1886_v42 = vadd.f32 %v1339_v1, %v824_v40  ;;  %v1507_v24 = vsel %vm466_vm0, %v1504_v27, %v1506_v51  ;;  %v1612_v32 = vadd.f32 %v1505_v15, %v1371_v4 }
  0x77   : > { %v1747_v28 = vrot.slane %v1648_v29, 2  ;;  %v3076_v47 = vunpack.c.h.bf16 %v249_v57  ;;  %v1613_v49 = vadd.f32 %v1507_v24, %v1372_v35  ;;  %v1746_v48 = vsel %vm708_vm1, %v1744_v54, %v1745_v56 }
  0x78   : > { %v3079_v20 = vunpack.c.l.bf16 %v251_v2  ;;  %v347_v58 = vmul.f32 %v2633_v6, %v2755_v63  ;;  %v1853_v62 = vadd.f32 %v1746_v48, %v1612_v32  ;;  %v348_v34 = vmul.f32 %v2633_v6, %v2757_v0 }
  0x79   : > { %v1748_v36 = vsel %vm708_vm1, %v1745_v56, %v1747_v28  ;;  %v385_v40 = vmul.f32 %v2635_v7, %v2755_v63  ;;  %v386_v35 = vmul.f32 %v2635_v7, %v2757_v0  ;;  %v387_v57 = vmul.f32 %v2635_v7, %v2762_v13 }
  0x7a   : > { %v1854_v4 = vadd.f32 %v1748_v36, %v1613_v49  ;;  %v627_v44 = vmul.f32 %v2637_v8, %v2755_v63  ;;  %v1917_v1 = vadd.f32 %v1885_v23, %v1853_v62  ;;  %v628_v45 = vmul.f32 %v2637_v8, %v2757_v0 }
  0x7b   : > { %v492_v27 = vrot.slane %v385_v40, 1  ;;  %v629_v51 = vmul.f32 %v2637_v8, %v2762_v13  ;;  %v493_v54 = vrot.slane %v386_v35, 1  ;;  %v495_v2 = vrot.slane %v387_v57, 1 }
  0x7c   : > { %v1918_v29 = vadd.f32 %v1886_v42, %v1854_v4  ;;  %v734_v15 = vrot.slane %v627_v44, 2  ;;  %v1953_v56 = vadd.f32 %v2769_v19, %v1917_v1  ;;  %v735_v24 = vrot.slane %v628_v45, 2 }
  0x7d   : > { %v737_v32 = vrot.slane %v629_v51, 2  ;;  %v864_v28 = vmul.f32 %v2715_v5, %v2644_v9  ;;  %v494_v49 = vsel %vm466_vm0, %v492_v27, %v493_v54  ;;  %v496_v48 = vsel %vm466_vm0, %v493_v54, %v495_v2 }
  0x7e   : > { %v1954_v23 = vadd.f32 %v2769_v19, %v1918_v29  ;;  %v865_v36 = vmul.f32 %v2738_v39, %v2644_v9  ;;  %v1985_v42 = vmax.f32 %v1953_v56, 0.0  ;;  %v589_v62 = vadd.f32 %v494_v49, %v347_v58 }
  0x7f   : > { %v590_v40 = vadd.f32 %v496_v48, %v348_v34  ;;  %v736_v4 = vsel %vm708_vm1, %v734_v15, %v735_v24  ;;  %v738_v57 = vsel %vm708_vm1, %v735_v24, %v737_v32  ;;  %v902_v44 = vmul.f32 %v2715_v5, %v2646_v10 }
  0x80   : > { %v1986_v35 = vmax.f32 %v1954_v23, 0.0  ;;  %v903_v1 = vmul.f32 %v2738_v39, %v2646_v10  ;;  %v831_v27 = vadd.f32 %v736_v4, %v589_v62  ;;  %v904_v51 = vmul.f32 %v2646_v10, %v2764_v14 }
  0x81   : > { %v832_v45 = vadd.f32 %v738_v57, %v590_v40  ;;  %v1143_v58 = vmul.f32 %v2715_v5, %v2648_v11  ;;  %v1008_v29 = vrot.slane %v902_v44, 1  ;;  %v1144_v2 = vmul.f32 %v2738_v39, %v2648_v11 }
  0x82   : > { %v2016_v34 = vpack.c.bf16 %v1986_v35, %v1985_v42  ;;  %v1009_v54 = vrot.slane %v903_v1, 1  ;;  %v1011_v15 = vrot.slane %v904_v51, 1  ;;  %v1145_v56 = vmul.f32 %v2648_v11, %v2764_v14 }
  0x83   : > { %v1249_v24 = vrot.slane %v1143_v58, 2  ;;  %v1379_v32 = vmul.f32 %v2650_v12, %v3072_v3  ;;  %v1250_v49 = vrot.slane %v1144_v2, 2  ;;  %v1380_v48 = vmul.f32 %v2650_v12, %v3076_v47  ;;  %v261_v58 = vld [vmem:[%s2642_s10 + $0x84] sm:$0xff]  }
  0x84   : > { %2112 = vmatmul.bf16.gmra.mxu0 %v2016_v34  ;;  %v1010_v23 = vsel %vm466_vm0, %v1008_v29, %v1009_v54  ;;  %v1417_v42 = vmul.f32 %v2655_v16, %v3072_v3  ;;  %v1012_v62 = vsel %vm466_vm0, %v1009_v54, %v1011_v15  ;;  %v1252_v4 = vrot.slane %v1145_v56, 2 }
  0x85   : > { %v1105_v40 = vadd.f32 %v1010_v23, %v864_v28  ;;  %v1418_v35 = vmul.f32 %v2655_v16, %v3076_v47  ;;  %v1106_v57 = vadd.f32 %v1012_v62, %v865_v36  ;;  %v1251_v44 = vsel %vm708_vm1, %v1249_v24, %v1250_v49  ;;  %v263_v24 = vld [vmem:[%s2642_s10 + $0x8c] sm:$0x1] }
  0x86   : > { %v1419_v1 = vmul.f32 %v2655_v16, %v3079_v20  ;;  %v1523_v51 = vrot.slane %v1417_v42, 1  ;;  %v1253_v34 = vsel %vm708_vm1, %v1250_v49, %v1252_v4  ;;  %v1658_v28 = vmul.f32 %v2657_v17, %v3072_v3 }
  0x87   : > { %v1346_v29 = vadd.f32 %v1251_v44, %v1105_v40  ;;  %v1524_v2 = vrot.slane %v1418_v35, 1  ;;  %v1347_v54 = vadd.f32 %v1253_v34, %v1106_v57  ;;  %v1659_v56 = vmul.f32 %v2657_v17, %v3076_v47 }
  0x88   : > { %v1526_v15 = vrot.slane %v1419_v1, 1  ;;  %v1660_v36 = vmul.f32 %v2657_v17, %v3079_v20  ;;  %v1764_v42 = vrot.slane %v1658_v28, 2  ;;  %v3143_v13 = vunpack.c.l.bf16 %v261_v58 }
  0x89   : > { %v1525_v23 = vsel %vm466_vm0, %v1523_v51, %v1524_v2  ;;  %v1893_v62 = vadd.f32 %v1346_v29, %v831_v27  ;;  %v1765_v4 = vrot.slane %v1659_v56, 2  ;;  %v1894_v44 = vadd.f32 %v1347_v54, %v832_v45 }
  0x8a   : > { %v1527_v49 = vsel %vm466_vm0, %v1524_v2, %v1526_v15  ;;  %v1620_v40 = vadd.f32 %v1525_v23, %v1379_v32  ;;  %v1767_v35 = vrot.slane %v1660_v36, 2  ;;  %v3146_v1 = vunpack.c.h.bf16 %v261_v58 }
  0x8b   : > { %v1621_v57 = vadd.f32 %v1527_v49, %v1380_v48  ;;  %v3148_v34 = vunpack.c.l.bf16 %v263_v24  ;;  %v1766_v0 = vsel %vm708_vm1, %v1764_v42, %v1765_v4  ;;  %v355_v27 = vmul.f32 %v2633_v6, %v2847_v37 }
  0x8c   : > { %v1768_v63 = vsel %vm708_vm1, %v1765_v4, %v1767_v35  ;;  %v356_v51 = vmul.f32 %v2633_v6, %v2850_v60  ;;  %v1861_v29 = vadd.f32 %v1766_v0, %v1620_v40  ;;  %v397_v48 = vmul.f32 %v2635_v7, %v2847_v37 }
  0x8d   : > { %v1862_v32 = vadd.f32 %v1768_v63, %v1621_v57  ;;  %v398_v45 = vmul.f32 %v2635_v7, %v2850_v60  ;;  %v399_v58 = vmul.f32 %v2635_v7, %v2852_v18  ;;  %v639_v2 = vmul.f32 %v2637_v8, %v2847_v37 }
  0x8e   : > { %v640_v28 = vmul.f32 %v2637_v8, %v2850_v60  ;;  %v641_v54 = vmul.f32 %v2637_v8, %v2852_v18  ;;  %v1925_v0 = vadd.f32 %v1893_v62, %v1861_v29  ;;  %v512_v15 = vrot.slane %v397_v48, 1 }
  0x8f   : > { %v1926_v63 = vadd.f32 %v1894_v44, %v1862_v32  ;;  %v513_v56 = vrot.slane %v398_v45, 1  ;;  %v515_v36 = vrot.slane %v399_v58, 1  ;;  %v754_v24 = vrot.slane %v639_v2, 2 }
  0x90   : > { %v755_v23 = vrot.slane %v640_v28, 2  ;;  %v757_v42 = vrot.slane %v641_v54, 2  ;;  %v1961_v49 = vadd.f32 %v2769_v19, %v1925_v0  ;;  %v872_v35 = vmul.f32 %v2836_v61, %v2644_v9 }
  0x91   : > { %v1962_v40 = vadd.f32 %v2769_v19, %v1926_v63  ;;  %v514_v4 = vsel %vm466_vm0, %v512_v15, %v513_v56  ;;  %v516_v57 = vsel %vm466_vm0, %v513_v56, %v515_v36  ;;  %v873_v45 = vmul.f32 %v2841_v22, %v2644_v9 }
  0x92   : > { %v597_v18 = vadd.f32 %v514_v4, %v355_v27  ;;  %v756_v62 = vsel %vm708_vm1, %v754_v24, %v755_v23  ;;  %v758_v44 = vsel %vm708_vm1, %v755_v23, %v757_v42  ;;  %v1993_v29 = vmax.f32 %v1961_v49, 0.0 }
  0x93   : > { %v1994_v32 = vmax.f32 %v1962_v40, 0.0  ;;  %v598_v48 = vadd.f32 %v516_v57, %v356_v51  ;;  %v914_v19 = vmul.f32 %v2836_v61, %v2646_v10  ;;  %v915_v2 = vmul.f32 %v2841_v22, %v2646_v10 }
  0x94   : > { %v839_v58 = vadd.f32 %v756_v62, %v597_v18  ;;  %v916_v27 = vmul.f32 %v2646_v10, %v2854_v30  ;;  %v1155_v0 = vmul.f32 %v2836_v61, %v2648_v11  ;;  %v1156_v51 = vmul.f32 %v2841_v22, %v2648_v11 }
  0x95   : > { %v2020_v28 = vpack.c.bf16 %v1994_v32, %v1993_v29  ;;  %v840_v54 = vadd.f32 %v758_v44, %v598_v48  ;;  %v1028_v63 = vrot.slane %v914_v19, 1  ;;  %v1029_v15 = vrot.slane %v915_v2, 1  ;;  %v273_v48 = vld [vmem:[%s2642_s10 + $0xb4] sm:$0xff]  }
  0x96   : > { %v1031_v18 = vrot.slane %v916_v27, 1  ;;  %v1157_v56 = vmul.f32 %v2648_v11, %v2854_v30  ;;  %v1269_v36 = vrot.slane %v1155_v0, 2  ;;  %v1270_v24 = vrot.slane %v1156_v51, 2 }
  0x97   : > { %2132 = vmatmul.bf16.gmra.mxu1 %v2020_v28  ;;  %v1387_v23 = vmul.f32 %v2650_v12, %v3143_v13  ;;  %v1388_v42 = vmul.f32 %v2650_v12, %v3146_v1  ;;  %v1030_v49 = vsel %vm466_vm0, %v1028_v63, %v1029_v15  ;;  %v1429_v57 = vmul.f32 %v2655_v16, %v3143_v13 }
  0x98   : > { %v1032_v40 = vsel %vm466_vm0, %v1029_v15, %v1031_v18  ;;  %v1272_v4 = vrot.slane %v1157_v56, 2  ;;  %v1113_v62 = vadd.f32 %v1030_v49, %v872_v35  ;;  %v1271_v29 = vsel %vm708_vm1, %v1269_v36, %v1270_v24  ;;  %v275_v56 = vld [vmem:[%s2642_s10 + $0xbc] sm:$0x1] }
  0x99   : > { %v1114_v44 = vadd.f32 %v1032_v40, %v873_v45  ;;  %v1430_v32 = vmul.f32 %v2655_v16, %v3146_v1  ;;  %v1431_v2 = vmul.f32 %v2655_v16, %v3148_v34  ;;  %v1543_v27 = vrot.slane %v1429_v57, 1 }
  0x9a   : > { %v1273_v19 = vsel %vm708_vm1, %v1270_v24, %v1272_v4  ;;  %v1670_v28 = vmul.f32 %v2657_v17, %v3143_v13  ;;  %v1354_v0 = vadd.f32 %v1271_v29, %v1113_v62  ;;  %v1671_v45 = vmul.f32 %v2657_v17, %v3146_v1 }
  0x9b   : > { %v1355_v51 = vadd.f32 %v1273_v19, %v1114_v44  ;;  %v1544_v35 = vrot.slane %v1430_v32, 1  ;;  %v1546_v63 = vrot.slane %v1431_v2, 1  ;;  %v1672_v15 = vmul.f32 %v2657_v17, %v3148_v34 }
  0x9c   : > { %v1784_v18 = vrot.slane %v1670_v28, 2  ;;  %v3212_v36 = vunpack.c.l.bf16 %v273_v48  ;;  %v1785_v49 = vrot.slane %v1671_v45, 2  ;;  %v1901_v40 = vadd.f32 %v1354_v0, %v839_v58 }
  0x9d   : > { %v1545_v24 = vsel %vm466_vm0, %v1543_v27, %v1544_v35  ;;  %v1902_v4 = vadd.f32 %v1355_v51, %v840_v54  ;;  %v1547_v57 = vsel %vm466_vm0, %v1544_v35, %v1546_v63  ;;  %v1787_v44 = vrot.slane %v1672_v15, 2 }
  0x9e   : > { %v1628_v62 = vadd.f32 %v1545_v24, %v1387_v23  ;;  %v3216_v29 = vunpack.c.h.bf16 %v273_v48  ;;  %v1629_v32 = vadd.f32 %v1547_v57, %v1388_v42  ;;  %v1786_v19 = vsel %vm708_vm1, %v1784_v18, %v1785_v49  ;;  %v3241_v24 = vld [vmem:[%s3896_s2] ss:$0 sm:$0xff] }
  0x9f   : > { %v3219_v2 = vunpack.c.l.bf16 %v275_v56  ;;  %v363_v28 = vmul.f32 %v2633_v6, %v2934_v43  ;;  %v1788_v60 = vsel %vm708_vm1, %v1785_v49, %v1787_v44  ;;  %v364_v58 = vmul.f32 %v2633_v6, %v2936_v53 }
  0xa0   : > { %v1869_v27 = vadd.f32 %v1786_v19, %v1628_v62  ;;  %v409_v54 = vmul.f32 %v2635_v7, %v2934_v43  ;;  %v1870_v23 = vadd.f32 %v1788_v60, %v1629_v32  ;;  %v410_v42 = vmul.f32 %v2635_v7, %v2936_v53 }
  0xa1   : > { %v411_v48 = vmul.f32 %v2635_v7, %v2938_v46  ;;  %v651_v0 = vmul.f32 %v2637_v8, %v2934_v43  ;;  %v652_v45 = vmul.f32 %v2637_v8, %v2936_v53  ;;  %v653_v63 = vmul.f32 %v2637_v8, %v2938_v46 }
  0xa2   : > { %v1933_v51 = vadd.f32 %v1901_v40, %v1869_v27  ;;  %v532_v35 = vrot.slane %v409_v54, 1  ;;  %v1934_v15 = vadd.f32 %v1902_v4, %v1870_v23  ;;  %v533_v18 = vrot.slane %v410_v42, 1 }
  0xa3   : > { %v535_v60 = vrot.slane %v411_v48, 1  ;;  %v774_v56 = vrot.slane %v651_v0, 2  ;;  %v775_v57 = vrot.slane %v652_v45, 2  ;;  %v777_v40 = vrot.slane %v653_v63, 2 }
  0xa4   : > { %v1969_v49 = vadd.f32 %v3241_v24, %v1933_v51  ;;  %v880_v62 = vmul.f32 %v2925_v21, %v2644_v9  ;;  %v1970_v44 = vadd.f32 %v3241_v24, %v1934_v15  ;;  %v534_v32 = vsel %vm466_vm0, %v532_v35, %v533_v18 }
  0xa5   : > { %v536_v4 = vsel %vm466_vm0, %v533_v18, %v535_v60  ;;  %v881_v19 = vmul.f32 %v2930_v41, %v2644_v9  ;;  %v605_v54 = vadd.f32 %v534_v32, %v363_v28  ;;  %v776_v42 = vsel %vm708_vm1, %v774_v56, %v775_v57 }
  0xa6   : > { %v2001_v27 = vmax.f32 %v1969_v49, 0.0  ;;  %v606_v23 = vadd.f32 %v536_v4, %v364_v58  ;;  %v2002_v48 = vmax.f32 %v1970_v44, 0.0  ;;  %v778_v0 = vsel %vm708_vm1, %v775_v57, %v777_v40 }
  0xa7   : > { %v926_v51 = vmul.f32 %v2925_v21, %v2646_v10  ;;  %v927_v45 = vmul.f32 %v2930_v41, %v2646_v10  ;;  %v847_v35 = vadd.f32 %v776_v42, %v605_v54  ;;  %v928_v15 = vmul.f32 %v2646_v10, %v2940_v33 }
  0xa8   : > { %v848_v63 = vadd.f32 %v778_v0, %v606_v23  ;;  %v1167_v28 = vmul.f32 %v2925_v21, %v2648_v11  ;;  %v2024_v58 = vpack.c.bf16 %v2002_v48, %v2001_v27  ;;  %v1168_v56 = vmul.f32 %v2930_v41, %v2648_v11 }
  0xa9   : > { %v1048_v18 = vrot.slane %v926_v51, 1  ;;  %v1049_v60 = vrot.slane %v927_v45, 1  ;;  %v1051_v49 = vrot.slane %v928_v15, 1  ;;  %v1169_v57 = vmul.f32 %v2648_v11, %v2940_v33 }
  0xaa   : > { %v1289_v40 = vrot.slane %v1167_v28, 2  ;;  %v1395_v44 = vmul.f32 %v2650_v12, %v3212_v36  ;;  %2152 = vmatmul.bf16.gmra.mxu2 %v2024_v58  ;;  %v1290_v4 = vrot.slane %v1168_v56, 2  ;;  %v1396_v27 = vmul.f32 %v2650_v12, %v3216_v29 }
  0xab   : > { %v1050_v32 = vsel %vm466_vm0, %v1048_v18, %v1049_v60  ;;  %v1441_v54 = vmul.f32 %v2655_v16, %v3212_v36  ;;  %v1052_v23 = vsel %vm466_vm0, %v1049_v60, %v1051_v49  ;;  %v1292_v48 = vrot.slane %v1169_v57, 2 }
  0xac   : > { %v1121_v42 = vadd.f32 %v1050_v32, %v880_v62  ;;  %v1442_v0 = vmul.f32 %v2655_v16, %v3216_v29  ;;  %v1122_v51 = vadd.f32 %v1052_v23, %v881_v19  ;;  %v1291_v45 = vsel %vm708_vm1, %v1289_v40, %v1290_v4 }
  0xad   : > { %v1443_v15 = vmul.f32 %v2655_v16, %v3219_v2  ;;  %v1563_v28 = vrot.slane %v1441_v54, 1  ;;  %v1293_v58 = vsel %vm708_vm1, %v1290_v4, %v1292_v48  ;;  %v1682_v46 = vmul.f32 %v2657_v17, %v3212_v36 }
  0xae   : > { %v1362_v18 = vadd.f32 %v1291_v45, %v1121_v42  ;;  %v1564_v56 = vrot.slane %v1442_v0, 1  ;;  %v1363_v60 = vadd.f32 %v1293_v58, %v1122_v51  ;;  %v1683_v49 = vmul.f32 %v2657_v17, %v3216_v29 }
  0xaf   : > { %v1566_v62 = vrot.slane %v1443_v15, 1  ;;  %v1684_v19 = vmul.f32 %v2657_v17, %v3219_v2  ;;  %v1804_v40 = vrot.slane %v1682_v46, 2  ;;  %v341_v4 = vmul.f32 %v2664_v25, %v2633_v6 }
  0xb0   : > { %v1565_v57 = vsel %vm466_vm0, %v1563_v28, %v1564_v56  ;;  %v1909_v32 = vadd.f32 %v1362_v18, %v847_v35  ;;  %v1805_v42 = vrot.slane %v1683_v49, 2  ;;  %v1910_v51 = vadd.f32 %v1363_v60, %v848_v63 }
  0xb1   : > { %v1567_v54 = vsel %vm466_vm0, %v1564_v56, %v1566_v62  ;;  %v1636_v23 = vadd.f32 %v1565_v57, %v1395_v44  ;;  %v1807_v48 = vrot.slane %v1684_v19, 2  ;;  %v342_v45 = vmul.f32 %v2666_v26, %v2633_v6 }
  0xb2   : > { %v1637_v0 = vadd.f32 %v1567_v54, %v1396_v27  ;;  %v376_v15 = vmul.f32 %v2664_v25, %v2635_v7  ;;  %v1806_v28 = vsel %vm708_vm1, %v1804_v40, %v1805_v42  ;;  %v377_v35 = vmul.f32 %v2666_v26, %v2635_v7 }
  0xb3   : > { %v1808_v46 = vsel %vm708_vm1, %v1805_v42, %v1807_v48  ;;  %v378_v44 = vmul.f32 %v2635_v7, %v2676_v31  ;;  %v1877_v58 = vadd.f32 %v1806_v28, %v1636_v23  ;;  %v618_v63 = vmul.f32 %v2664_v25, %v2637_v8 }
  0xb4   : > { %v1878_v18 = vadd.f32 %v1808_v46, %v1637_v0  ;;  %v477_v27 = vrot.slane %v376_v15, 1  ;;  %v478_v56 = vrot.slane %v377_v35, 1  ;;  %v619_v62 = vmul.f32 %v2666_v26, %v2637_v8 }
  0xb5   : > { %v480_v60 = vrot.slane %v378_v44, 1  ;;  %v620_v49 = vmul.f32 %v2637_v8, %v2676_v31  ;;  %v1941_v19 = vadd.f32 %v1909_v32, %v1877_v58  ;;  %v719_v40 = vrot.slane %v618_v63, 2 }
  0xb6   : > { %v1942_v57 = vadd.f32 %v1910_v51, %v1878_v18  ;;  %v858_v54 = vmul.f32 %v2644_v9, %v3004_v52  ;;  %v479_v23 = vsel %vm466_vm0, %v477_v27, %v478_v56  ;;  %v720_v48 = vrot.slane %v619_v62, 2 }
  0xb7   : > { %v481_v42 = vsel %vm466_vm0, %v478_v56, %v480_v60  ;;  %v722_v25 = vrot.slane %v620_v49, 2  ;;  %v1977_v0 = vadd.f32 %v3241_v24, %v1941_v19  ;;  %v583_v26 = vadd.f32 %v479_v23, %v341_v4 }
  0xb8   : > { %v1978_v15 = vadd.f32 %v3241_v24, %v1942_v57  ;;  %v584_v28 = vadd.f32 %v481_v42, %v342_v45  ;;  %v721_v31 = vsel %vm708_vm1, %v719_v40, %v720_v48  ;;  %v859_v51 = vmul.f32 %v2644_v9, %v3006_v59 }
  0xb9   : > { %v723_v32 = vsel %vm708_vm1, %v720_v48, %v722_v25  ;;  %v893_v46 = vmul.f32 %v2646_v10, %v3004_v52  ;;  %v2009_v35 = vmax.f32 %v1977_v0, 0.0  ;;  %v825_v58 = vadd.f32 %v721_v31, %v583_v26 }
  0xba   : > { %v2010_v44 = vmax.f32 %v1978_v15, 0.0  ;;  %v826_v18 = vadd.f32 %v723_v32, %v584_v28  ;;  %v894_v27 = vmul.f32 %v2646_v10, %v3006_v59  ;;  %v895_v4 = vmul.f32 %v2646_v10, %v3008_v50  ;;  %v3942_v28 = vld [vmem:[#allocation2_spill] sm:$0xff] }
  0xbb   : > { %v993_v45 = vrot.slane %v893_v46, 1  ;;  %v1134_v63 = vmul.f32 %v2648_v11, %v3004_v52  ;;  %v1135_v60 = vmul.f32 %v2648_v11, %v3006_v59  ;;  %v1136_v62 = vmul.f32 %v2648_v11, %v3008_v50 }
  0xbc   : > { %v2028_v56 = vpack.c.bf16 %v2010_v44, %v2009_v35  ;;  %v1373_v49 = vmul.f32 %v2684_v38, %v2650_v12  ;;  %v994_v19 = vrot.slane %v894_v27, 1  ;;  %v996_v57 = vrot.slane %v895_v4, 1 }
  0xbd   : > { %v1234_v40 = vrot.slane %v1134_v63, 2  ;;  %v1374_v23 = vmul.f32 %v2703_v55, %v2650_v12  ;;  %v1235_v42 = vrot.slane %v1135_v60, 2  ;;  %v1237_v48 = vrot.slane %v1136_v62, 2 }
  0xbe   : > { %2172 = vmatmul.bf16.gmra.mxu3 %v2028_v56  ;;  %v1408_v25 = vmul.f32 %v2684_v38, %v2655_v16  ;;  %v1409_v0 = vmul.f32 %v2703_v55, %v2655_v16  ;;  %v995_v15 = vsel %vm466_vm0, %v993_v45, %v994_v19  ;;  %v997_v26 = vsel %vm466_vm0, %v994_v19, %v996_v57 }
  0xbf   : > { %v1410_v31 = vmul.f32 %v2655_v16, %v3942_v28  ;;  %v1649_v32 = vmul.f32 %v2684_v38, %v2657_v17  ;;  %v1099_v46 = vadd.f32 %v995_v15, %v858_v54  ;;  %v1100_v35 = vadd.f32 %v997_v26, %v859_v51 }
  0xc0   : > { %v1236_v44 = vsel %vm708_vm1, %v1234_v40, %v1235_v42  ;;  %v1238_v27 = vsel %vm708_vm1, %v1235_v42, %v1237_v48  ;;  %v1508_v4 = vrot.slane %v1408_v25, 1  ;;  %v1509_v63 = vrot.slane %v1409_v0, 1 }
  0xc1   : > { %v1511_v56 = vrot.slane %v1410_v31, 1  ;;  %v1650_v45 = vmul.f32 %v2703_v55, %v2657_v17  ;;  %v1340_v60 = vadd.f32 %v1236_v44, %v1099_v46  ;;  %v1341_v62 = vadd.f32 %v1238_v27, %v1100_v35 }
  0xc2   : > { %v1651_v19 = vmul.f32 %v2657_v17, %v3942_v28  ;;  %v1749_v57 = vrot.slane %v1649_v32, 2  ;;  %v1510_v53 = vsel %vm466_vm0, %v1508_v4, %v1509_v63  ;;  %v349_v40 = vmul.f32 %v2715_v5, %v2633_v6 }
  0xc3   : > { %v1512_v54 = vsel %vm466_vm0, %v1509_v63, %v1511_v56  ;;  %v1750_v51 = vrot.slane %v1650_v45, 2  ;;  %v1614_v42 = vadd.f32 %v1510_v53, %v1373_v49  ;;  %v1887_v0 = vadd.f32 %v1340_v60, %v825_v58 }
  0xc4   : > { %v1615_v48 = vadd.f32 %v1512_v54, %v1374_v23  ;;  %v1752_v25 = vrot.slane %v1651_v19, 2  ;;  %v1888_v26 = vadd.f32 %v1341_v62, %v826_v18  ;;  %v350_v31 = vmul.f32 %v2738_v39, %v2633_v6 }
  0xc5   : > { %v1751_v15 = vsel %vm708_vm1, %v1749_v57, %v1750_v51  ;;  %v388_v32 = vmul.f32 %v2715_v5, %v2635_v7  ;;  %v389_v44 = vmul.f32 %v2738_v39, %v2635_v7  ;;  %v390_v53 = vmul.f32 %v2635_v7, %v2764_v14 }
  0xc6   : > { %v1753_v46 = vsel %vm708_vm1, %v1750_v51, %v1752_v25  ;;  %v1855_v35 = vadd.f32 %v1751_v15, %v1614_v42  ;;  %v630_v18 = vmul.f32 %v2715_v5, %v2637_v8  ;;  %v631_v23 = vmul.f32 %v2738_v39, %v2637_v8 }
  0xc7   : > { %v1856_v49 = vadd.f32 %v1753_v46, %v1615_v48  ;;  %v497_v58 = vrot.slane %v388_v32, 1  ;;  %v498_v4 = vrot.slane %v389_v44, 1  ;;  %v500_v63 = vrot.slane %v390_v53, 1 }
  0xc8   : > { %v1919_v27 = vadd.f32 %v1887_v0, %v1855_v35  ;;  %v632_v56 = vmul.f32 %v2637_v8, %v2764_v14  ;;  %v739_v60 = vrot.slane %v630_v18, 2  ;;  %v740_v62 = vrot.slane %v631_v23, 2 }
  0xc9   : > { %v1920_v45 = vadd.f32 %v1888_v26, %v1856_v49  ;;  %v866_v19 = vmul.f32 %v2644_v9, %v3072_v3  ;;  %v499_v54 = vsel %vm466_vm0, %v497_v58, %v498_v4  ;;  %v501_v5 = vsel %vm466_vm0, %v498_v4, %v500_v63 }
  0xca   : > { %v1955_v57 = vadd.f32 %v3241_v24, %v1919_v27  ;;  %v742_v51 = vrot.slane %v632_v56, 2  ;;  %v591_v42 = vadd.f32 %v499_v54, %v349_v40  ;;  %v592_v48 = vadd.f32 %v501_v5, %v350_v31  ;;  %v3943_v27 = vld [vmem:[#allocation6_spill] sm:$0xff] }
  0xcb   : > { %v1956_v39 = vadd.f32 %v3241_v24, %v1920_v45  ;;  %v741_v25 = vsel %vm708_vm1, %v739_v60, %v740_v62  ;;  %v867_v15 = vmul.f32 %v2644_v9, %v3076_v47  ;;  %v905_v26 = vmul.f32 %v2646_v10, %v3072_v3  ;;  %v3944_v60 = vld [vmem:[#allocation7_spill] sm:$0xff] }
  0xcc   : > { %v1987_v14 = vmax.f32 %v1955_v57, 0.0  ;;  %v743_v0 = vsel %vm708_vm1, %v740_v62, %v742_v51  ;;  %v833_v46 = vadd.f32 %v741_v25, %v591_v42  ;;  %v906_v44 = vmul.f32 %v2646_v10, %v3076_v47  ;;  %v3945_v25 = vld [vmem:[#allocation8_spill] sm:$0xff] }
  0xcd   : > { %v1988_v32 = vmax.f32 %v1956_v39, 0.0  ;;  %v834_v35 = vadd.f32 %v743_v0, %v592_v48  ;;  %v907_v40 = vmul.f32 %v2646_v10, %v3079_v20  ;;  %v1013_v31 = vrot.slane %v905_v26, 1 }
  0xce   : > { %v1146_v53 = vmul.f32 %v2648_v11, %v3072_v3  ;;  %v1147_v49 = vmul.f32 %v2648_v11, %v3076_v47  ;;  %v1014_v18 = vrot.slane %v906_v44, 1  ;;  %v1148_v23 = vmul.f32 %v2648_v11, %v3079_v20 }
  0xcf   : > { %v2017_v58 = vpack.c.bf16 %v1988_v32, %v1987_v14  ;;  %v1381_v4 = vmul.f32 %v3943_v27, %v2650_v12  ;;  %v1016_v63 = vrot.slane %v907_v40, 1  ;;  %v1382_v62 = vmul.f32 %v3944_v60, %v2650_v12 }
  0xd0   : > { %v1254_v56 = vrot.slane %v1146_v53, 2  ;;  %v1255_v45 = vrot.slane %v1147_v49, 2  ;;  %v1015_v57 = vsel %vm466_vm0, %v1013_v31, %v1014_v18  ;;  %v1257_v54 = vrot.slane %v1148_v23, 2 }
  0xd1   : > { %2117 = vmatmul.bf16.gmra.mxu0 %v2017_v58  ;;  %v1420_v5 = vmul.f32 %v3943_v27, %v2655_v16  ;;  %v1421_v51 = vmul.f32 %v3944_v60, %v2655_v16  ;;  %v1017_v39 = vsel %vm466_vm0, %v1014_v18, %v1016_v63  ;;  %v1107_v42 = vadd.f32 %v1015_v57, %v866_v19 }
  0xd2   : > { %v1256_v48 = vsel %vm708_vm1, %v1254_v56, %v1255_v45  ;;  %v1422_v14 = vmul.f32 %v2655_v16, %v3945_v25  ;;  %v1108_v0 = vadd.f32 %v1017_v39, %v867_v15  ;;  %v1258_v26 = vsel %vm708_vm1, %v1255_v45, %v1257_v54 }
  0xd3   : > { %v1528_v32 = vrot.slane %v1420_v5, 1  ;;  %v1529_v44 = vrot.slane %v1421_v51, 1  ;;  %v1348_v40 = vadd.f32 %v1256_v48, %v1107_v42  ;;  %v1661_v53 = vmul.f32 %v3943_v27, %v2657_v17 }
  0xd4   : > { %v1531_v31 = vrot.slane %v1422_v14, 1  ;;  %v1662_v49 = vmul.f32 %v3944_v60, %v2657_v17  ;;  %v1349_v58 = vadd.f32 %v1258_v26, %v1108_v0  ;;  %v1663_v18 = vmul.f32 %v2657_v17, %v3945_v25 }
  0xd5   : > { %v1530_v19 = vsel %vm466_vm0, %v1528_v32, %v1529_v44  ;;  %v357_v15 = vmul.f32 %v2836_v61, %v2633_v6  ;;  %v1769_v56 = vrot.slane %v1661_v53, 2  ;;  %v1895_v5 = vadd.f32 %v1348_v40, %v833_v46 }
  0xd6   : > { %v1532_v23 = vsel %vm466_vm0, %v1529_v44, %v1531_v31  ;;  %v1622_v63 = vadd.f32 %v1530_v19, %v1381_v4  ;;  %v1770_v45 = vrot.slane %v1662_v49, 2  ;;  %v1772_v54 = vrot.slane %v1663_v18, 2 }
  0xd7   : > { %v1623_v57 = vadd.f32 %v1532_v23, %v1382_v62  ;;  %v1896_v51 = vadd.f32 %v1349_v58, %v834_v35  ;;  %v358_v42 = vmul.f32 %v2841_v22, %v2633_v6  ;;  %v400_v48 = vmul.f32 %v2836_v61, %v2635_v7 }
  0xd8   : > { %v1771_v39 = vsel %vm708_vm1, %v1769_v56, %v1770_v45  ;;  %v401_v14 = vmul.f32 %v2841_v22, %v2635_v7  ;;  %v1773_v0 = vsel %vm708_vm1, %v1770_v45, %v1772_v54  ;;  %v402_v62 = vmul.f32 %v2635_v7, %v2854_v30 }
  0xd9   : > { %v1863_v4 = vadd.f32 %v1771_v39, %v1622_v63  ;;  %v642_v46 = vmul.f32 %v2836_v61, %v2637_v8  ;;  %v1864_v35 = vadd.f32 %v1773_v0, %v1623_v57  ;;  %v517_v26 = vrot.slane %v400_v48, 1 }
  0xda   : > { %v518_v32 = vrot.slane %v401_v14, 1  ;;  %v643_v44 = vmul.f32 %v2841_v22, %v2637_v8  ;;  %v520_v31 = vrot.slane %v402_v62, 1  ;;  %v644_v53 = vmul.f32 %v2637_v8, %v2854_v30 }
  0xdb   : > { %v1927_v40 = vadd.f32 %v1895_v5, %v1863_v4  ;;  %v759_v49 = vrot.slane %v642_v46, 2  ;;  %v1928_v58 = vadd.f32 %v1896_v51, %v1864_v35  ;;  %v874_v23 = vmul.f32 %v2644_v9, %v3143_v13 }
  0xdc   : > { %v519_v19 = vsel %vm466_vm0, %v517_v26, %v518_v32  ;;  %v760_v18 = vrot.slane %v643_v44, 2  ;;  %v521_v63 = vsel %vm466_vm0, %v518_v32, %v520_v31  ;;  %v762_v45 = vrot.slane %v644_v53, 2 }
  0xdd   : > { %v1963_v61 = vadd.f32 %v3241_v24, %v1927_v40  ;;  %v599_v56 = vadd.f32 %v519_v19, %v357_v15  ;;  %v1964_v22 = vadd.f32 %v3241_v24, %v1928_v58  ;;  %v600_v57 = vadd.f32 %v521_v63, %v358_v42  ;;  %v3946_v40 = vld [vmem:[#allocation11_spill] sm:$0xff]  ;;  %v3947_v19 = vld [vmem:[#allocation12_spill] sm:$0xff] }
  0xde   : > { %v761_v54 = vsel %vm708_vm1, %v759_v49, %v760_v18  ;;  %v875_v30 = vmul.f32 %v2644_v9, %v3146_v1  ;;  %v763_v51 = vsel %vm708_vm1, %v760_v18, %v762_v45  ;;  %v917_v48 = vmul.f32 %v2646_v10, %v3143_v13 }
  0xdf   : > { %v1995_v5 = vmax.f32 %v1963_v61, 0.0  ;;  %v841_v39 = vadd.f32 %v761_v54, %v599_v56  ;;  %v1996_v14 = vmax.f32 %v1964_v22, 0.0  ;;  %v842_v0 = vadd.f32 %v763_v51, %v600_v57  ;;  %v2513_v51 = vld [vmem:[%s2642_s10 + $0xc0] sm:$0xff]  }
  0xe0   : > { %v918_v15 = vmul.f32 %v2646_v10, %v3146_v1  ;;  %v919_v42 = vmul.f32 %v2646_v10, %v3148_v34  ;;  %v1033_v4 = vrot.slane %v917_v48, 1  ;;  %v1158_v62 = vmul.f32 %v2648_v11, %v3143_v13  ;;  %v3948_v48 = vld [vmem:[#allocation13_spill] sm:$0xff] }
  0xe1   : > { %v1159_v46 = vmul.f32 %v2648_v11, %v3146_v1  ;;  %v1160_v35 = vmul.f32 %v2648_v11, %v3148_v34  ;;  %v2021_v26 = vpack.c.bf16 %v1996_v14, %v1995_v5  ;;  %v1389_v31 = vmul.f32 %v3946_v40, %v2650_v12 }
  0xe2   : > { %v1034_v32 = vrot.slane %v918_v15, 1  ;;  %v1036_v44 = vrot.slane %v919_v42, 1  ;;  %v1274_v53 = vrot.slane %v1158_v62, 2  ;;  %v1390_v18 = vmul.f32 %v3947_v19, %v2650_v12 }
  0xe3   : > { %v1275_v49 = vrot.slane %v1159_v46, 2  ;;  %v1277_v58 = vrot.slane %v1160_v35, 2  ;;  %2137 = vmatmul.bf16.gmra.mxu1 %v2021_v26  ;;  %v1432_v56 = vmul.f32 %v3946_v40, %v2655_v16  ;;  %v1433_v45 = vmul.f32 %v3947_v19, %v2655_v16 }
  0xe4   : > { %v1035_v61 = vsel %vm466_vm0, %v1033_v4, %v1034_v32  ;;  %v1037_v63 = vsel %vm466_vm0, %v1034_v32, %v1036_v44  ;;  %v1434_v14 = vmul.f32 %v2655_v16, %v3948_v48  ;;  %v1673_v4 = vmul.f32 %v3946_v40, %v2657_v17 }
  0xe5   : > { %v1115_v22 = vadd.f32 %v1035_v61, %v874_v23  ;;  %v1116_v57 = vadd.f32 %v1037_v63, %v875_v30  ;;  %v1276_v54 = vsel %vm708_vm1, %v1274_v53, %v1275_v49  ;;  %v1278_v5 = vsel %vm708_vm1, %v1275_v49, %v1277_v58  ;;  %v278_v30 = vld [vmem:[%s2642_s10 + $0xc8] sm:$0x1] }
  0xe6   : > { %v1548_v15 = vrot.slane %v1432_v56, 1  ;;  %v1549_v42 = vrot.slane %v1433_v45, 1  ;;  %v1674_v35 = vmul.f32 %v3947_v19, %v2657_v17  ;;  %v1675_v23 = vmul.f32 %v2657_v17, %v3948_v48 }
  0xe7   : > { %v1356_v62 = vadd.f32 %v1276_v54, %v1115_v22  ;;  %v1357_v46 = vadd.f32 %v1278_v5, %v1116_v57  ;;  %v1551_v32 = vrot.slane %v1434_v14, 1  ;;  %v1789_v44 = vrot.slane %v1673_v4, 2 }
  0xe8   : > { %v1550_v26 = vsel %vm466_vm0, %v1548_v15, %v1549_v42  ;;  %v3474_v53 = vunpack.c.l.bf16 %v2513_v51  ;;  %v1790_v58 = vrot.slane %v1674_v35, 2  ;;  %v1792_v61 = vrot.slane %v1675_v23, 2 }
  0xe9   : > { %v1630_v49 = vadd.f32 %v1550_v26, %v1389_v31  ;;  %v1903_v63 = vadd.f32 %v1356_v62, %v841_v39  ;;  %v1552_v56 = vsel %vm466_vm0, %v1549_v42, %v1551_v32  ;;  %v1904_v45 = vadd.f32 %v1357_v46, %v842_v0 }
  0xea   : > { %v3477_v22 = vunpack.c.h.bf16 %v2513_v51  ;;  %v3479_v57 = vunpack.c.l.bf16 %v278_v30  ;;  %v1631_v54 = vadd.f32 %v1552_v56, %v1390_v18  ;;  %v1791_v5 = vsel %vm708_vm1, %v1789_v44, %v1790_v58 }
  0xeb   : > { %v1793_v15 = vsel %vm708_vm1, %v1790_v58, %v1792_v61  ;;  %v365_v14 = vmul.f32 %v2925_v21, %v2633_v6  ;;  %v1871_v4 = vadd.f32 %v1791_v5, %v1630_v49  ;;  %v366_v31 = vmul.f32 %v2930_v41, %v2633_v6 }
  0xec   : > { %v412_v39 = vmul.f32 %v2925_v21, %v2635_v7  ;;  %v413_v0 = vmul.f32 %v2930_v41, %v2635_v7  ;;  %v1872_v51 = vadd.f32 %v1793_v15, %v1631_v54  ;;  %v414_v18 = vmul.f32 %v2635_v7, %v2940_v33 }
  0xed   : > { %v654_v42 = vmul.f32 %v2925_v21, %v2637_v8  ;;  %v655_v62 = vmul.f32 %v2930_v41, %v2637_v8  ;;  %v1935_v46 = vadd.f32 %v1903_v63, %v1871_v4  ;;  %v656_v30 = vmul.f32 %v2637_v8, %v2940_v33 }
  0xee   : > { %v537_v35 = vrot.slane %v412_v39, 1  ;;  %v538_v23 = vrot.slane %v413_v0, 1  ;;  %v1936_v26 = vadd.f32 %v1904_v45, %v1872_v51  ;;  %v540_v32 = vrot.slane %v414_v18, 1 }
  0xef   : > { %v779_v44 = vrot.slane %v654_v42, 2  ;;  %v780_v49 = vrot.slane %v655_v62, 2  ;;  %v1971_v58 = vadd.f32 %v3241_v24, %v1935_v46  ;;  %v782_v56 = vrot.slane %v656_v30, 2 }
  0xf0   : > { %v539_v61 = vsel %vm466_vm0, %v537_v35, %v538_v23  ;;  %v882_v21 = vmul.f32 %v2644_v9, %v3212_v36  ;;  %v1972_v41 = vadd.f32 %v3241_v24, %v1936_v26  ;;  %v541_v63 = vsel %vm466_vm0, %v538_v23, %v540_v32 }
  0xf1   : > { %v607_v54 = vadd.f32 %v539_v61, %v365_v14  ;;  %v781_v5 = vsel %vm708_vm1, %v779_v44, %v780_v49  ;;  %v2003_v33 = vmax.f32 %v1971_v58, 0.0  ;;  %v608_v45 = vadd.f32 %v541_v63, %v366_v31 }
  0xf2   : > { %v783_v15 = vsel %vm708_vm1, %v780_v49, %v782_v56  ;;  %v883_v4 = vmul.f32 %v2644_v9, %v3216_v29  ;;  %v2004_v39 = vmax.f32 %v1972_v41, 0.0  ;;  %v929_v51 = vmul.f32 %v2646_v10, %v3212_v36 }
  0xf3   : > { %v849_v0 = vadd.f32 %v781_v5, %v607_v54  ;;  %v930_v18 = vmul.f32 %v2646_v10, %v3216_v29  ;;  %v850_v42 = vadd.f32 %v783_v15, %v608_v45  ;;  %v931_v14 = vmul.f32 %v2646_v10, %v3219_v2 }
  0xf4   : > { %v1170_v31 = vmul.f32 %v2648_v11, %v3212_v36  ;;  %v1171_v62 = vmul.f32 %v2648_v11, %v3216_v29  ;;  %v2025_v46 = vpack.c.bf16 %v2004_v39, %v2003_v33  ;;  %v1053_v35 = vrot.slane %v929_v51, 1 }
  0xf5   : > { %v1054_v23 = vrot.slane %v930_v18, 1  ;;  %v1172_v30 = vmul.f32 %v2648_v11, %v3219_v2  ;;  %v1056_v26 = vrot.slane %v931_v14, 1  ;;  %v1397_v49 = vmul.f32 %v3474_v53, %v2650_v12 }
  0xf6   : > { %v1294_v32 = vrot.slane %v1170_v31, 2  ;;  %v1295_v44 = vrot.slane %v1171_v62, 2  ;;  %2157 = vmatmul.bf16.gmra.mxu2 %v2025_v46  ;;  %v1398_v56 = vmul.f32 %v3477_v22, %v2650_v12  ;;  %v1444_v41 = vmul.f32 %v3474_v53, %v2655_v16 }
  0xf7   : > { %v1055_v58 = vsel %vm466_vm0, %v1053_v35, %v1054_v23  ;;  %v1297_v61 = vrot.slane %v1172_v30, 2  ;;  %v1057_v63 = vsel %vm466_vm0, %v1054_v23, %v1056_v26  ;;  %v1445_v33 = vmul.f32 %v3477_v22, %v2655_v16 }
  0xf8   : > { %v1123_v54 = vadd.f32 %v1055_v58, %v882_v21  ;;  %v1296_v5 = vsel %vm708_vm1, %v1294_v32, %v1295_v44  ;;  %v1124_v45 = vadd.f32 %v1057_v63, %v883_v4  ;;  %v1446_v39 = vmul.f32 %v2655_v16, %v3479_v57 }
  0xf9   : > { %v1298_v15 = vsel %vm708_vm1, %v1295_v44, %v1297_v61  ;;  %v1568_v51 = vrot.slane %v1444_v41, 1  ;;  %v1569_v14 = vrot.slane %v1445_v33, 1  ;;  %v1685_v31 = vmul.f32 %v3474_v53, %v2657_v17 }
  0xfa   : > { %v1364_v18 = vadd.f32 %v1296_v5, %v1123_v54  ;;  %v1686_v21 = vmul.f32 %v3477_v22, %v2657_v17  ;;  %v1365_v62 = vadd.f32 %v1298_v15, %v1124_v45  ;;  %v1571_v46 = vrot.slane %v1446_v39, 1 }
  0xfb   : > { %v1687_v35 = vmul.f32 %v2657_v17, %v3479_v57  ;;  %v343_v4 = vmul.f32 %v2633_v6, %v3004_v52  ;;  %v1570_v23 = vsel %vm466_vm0, %v1568_v51, %v1569_v14  ;;  %v1809_v30 = vrot.slane %v1685_v31, 2 }
  0xfc   : > { %v1810_v26 = vrot.slane %v1686_v21, 2  ;;  %v1911_v32 = vadd.f32 %v1364_v18, %v849_v0  ;;  %v1572_v44 = vsel %vm466_vm0, %v1569_v14, %v1571_v46  ;;  %v1638_v58 = vadd.f32 %v1570_v23, %v1397_v49 }
  0xfd   : > { %v1812_v61 = vrot.slane %v1687_v35, 2  ;;  %v1912_v41 = vadd.f32 %v1365_v62, %v850_v42  ;;  %v1639_v63 = vadd.f32 %v1572_v44, %v1398_v56  ;;  %v344_v5 = vmul.f32 %v2633_v6, %v3006_v59 }
  0xfe   : > { %v1811_v54 = vsel %vm708_vm1, %v1809_v30, %v1810_v26  ;;  %v379_v33 = vmul.f32 %v2635_v7, %v3004_v52  ;;  %v380_v0 = vmul.f32 %v2635_v7, %v3006_v59  ;;  %v381_v49 = vmul.f32 %v2635_v7, %v3008_v50 }
  0xff   : > { %v1813_v45 = vsel %vm708_vm1, %v1810_v26, %v1812_v61  ;;  %v1879_v15 = vadd.f32 %v1811_v54, %v1638_v58  ;;  %v621_v56 = vmul.f32 %v2637_v8, %v3004_v52  ;;  %v622_v51 = vmul.f32 %v2637_v8, %v3006_v59 }
 0x100   : > { %v1880_v39 = vadd.f32 %v1813_v45, %v1639_v63  ;;  %v482_v42 = vrot.slane %v379_v33, 1  ;;  %v483_v14 = vrot.slane %v380_v0, 1  ;;  %v485_v31 = vrot.slane %v381_v49, 1 }
 0x101   : > { %v1943_v18 = vadd.f32 %v1911_v32, %v1879_v15  ;;  %v623_v21 = vmul.f32 %v2637_v8, %v3008_v50  ;;  %v724_v46 = vrot.slane %v621_v56, 2  ;;  %v725_v35 = vrot.slane %v622_v51, 2 }
 0x102   : > { %v1944_v62 = vadd.f32 %v1912_v41, %v1880_v39  ;;  %v860_v23 = vmul.f32 %v2684_v38, %v2644_v9  ;;  %v484_v26 = vsel %vm466_vm0, %v482_v42, %v483_v14  ;;  %v486_v52 = vsel %vm466_vm0, %v483_v14, %v485_v31 }
 0x103   : > { %v1979_v30 = vadd.f32 %v3241_v24, %v1943_v18  ;;  %v727_v44 = vrot.slane %v623_v21, 2  ;;  %v585_v32 = vadd.f32 %v484_v26, %v343_v4  ;;  %v586_v58 = vadd.f32 %v486_v52, %v344_v5  ;;  %v3949_v18 = vld [vmem:[#allocation3_spill] sm:$0xff] }
 0x104   : > { %v1980_v59 = vadd.f32 %v3241_v24, %v1944_v62  ;;  %v726_v61 = vsel %vm708_vm1, %v724_v46, %v725_v35  ;;  %v861_v63 = vmul.f32 %v2703_v55, %v2644_v9  ;;  %v896_v54 = vmul.f32 %v2684_v38, %v2646_v10  ;;  %v3950_v46 = vld [vmem:[#allocation4_spill] sm:$0xff] }
 0x105   : > { %v2011_v50 = vmax.f32 %v1979_v30, 0.0  ;;  %v728_v41 = vsel %vm708_vm1, %v725_v35, %v727_v44  ;;  %v827_v45 = vadd.f32 %v726_v61, %v585_v32  ;;  %v897_v0 = vmul.f32 %v2703_v55, %v2646_v10 }
 0x106   : > { %v2012_v33 = vmax.f32 %v1980_v59, 0.0  ;;  %v828_v15 = vadd.f32 %v728_v41, %v586_v58  ;;  %v898_v4 = vmul.f32 %v2646_v10, %v3942_v28  ;;  %v998_v5 = vrot.slane %v896_v54, 1  ;;  %v3951_v59 = vld [vmem:[#allocation5_spill] sm:$0xff] }
 0x107   : > { %v1137_v49 = vmul.f32 %v2684_v38, %v2648_v11  ;;  %v1138_v39 = vmul.f32 %v2703_v55, %v2648_v11  ;;  %v999_v56 = vrot.slane %v897_v0, 1  ;;  %v1139_v51 = vmul.f32 %v2648_v11, %v3942_v28 }
 0x108   : > { %v2029_v42 = vpack.c.bf16 %v2012_v33, %v2011_v50  ;;  %v1375_v14 = vmul.f32 %v2650_v12, %v3949_v18  ;;  %v1001_v31 = vrot.slane %v898_v4, 1  ;;  %v1376_v35 = vmul.f32 %v2650_v12, %v3950_v46 }
 0x109   : > { %v1239_v21 = vrot.slane %v1137_v49, 2  ;;  %v1240_v62 = vrot.slane %v1138_v39, 2  ;;  %v1000_v38 = vsel %vm466_vm0, %v998_v5, %v999_v56  ;;  %v1242_v30 = vrot.slane %v1139_v51, 2 }
 0x10a   : > { %2177 = vmatmul.bf16.gmra.mxu3 %v2029_v42  ;;  %v1411_v55 = vmul.f32 %v2655_v16, %v3949_v18  ;;  %v1412_v26 = vmul.f32 %v2655_v16, %v3950_v46  ;;  %v1002_v28 = vsel %vm466_vm0, %v999_v56, %v1001_v31  ;;  %v1101_v52 = vadd.f32 %v1000_v38, %v860_v23 }
 0x10b   : > { %v1241_v44 = vsel %vm708_vm1, %v1239_v21, %v1240_v62  ;;  %v1413_v32 = vmul.f32 %v2655_v16, %v3951_v59  ;;  %v1102_v58 = vadd.f32 %v1002_v28, %v861_v63  ;;  %v1243_v61 = vsel %vm708_vm1, %v1240_v62, %v1242_v30 }
 0x10c   : > { %v1513_v50 = vrot.slane %v1411_v55, 1  ;;  %v1514_v41 = vrot.slane %v1412_v26, 1  ;;  %v1342_v54 = vadd.f32 %v1241_v44, %v1101_v52  ;;  %v1652_v0 = vmul.f32 %v2657_v17, %v3949_v18 }
 0x10d   : > { %v1516_v33 = vrot.slane %v1413_v32, 1  ;;  %v1653_v4 = vmul.f32 %v2657_v17, %v3950_v46  ;;  %v1343_v5 = vadd.f32 %v1243_v61, %v1102_v58  ;;  %v1654_v49 = vmul.f32 %v2657_v17, %v3951_v59 }
 0x10e   : > { %v1515_v23 = vsel %vm466_vm0, %v1513_v50, %v1514_v41  ;;  %v351_v63 = vmul.f32 %v2633_v6, %v3072_v3  ;;  %v1754_v56 = vrot.slane %v1652_v0, 2  ;;  %v1889_v18 = vadd.f32 %v1342_v54, %v827_v45 }
 0x10f   : > { %v1517_v39 = vsel %vm466_vm0, %v1514_v41, %v1516_v33  ;;  %v1616_v42 = vadd.f32 %v1515_v23, %v1375_v14  ;;  %v1755_v51 = vrot.slane %v1653_v4, 2  ;;  %v1757_v21 = vrot.slane %v1654_v49, 2 }
 0x110   : > { %v1617_v31 = vadd.f32 %v1517_v39, %v1376_v35  ;;  %v1890_v62 = vadd.f32 %v1343_v5, %v828_v15  ;;  %v352_v38 = vmul.f32 %v2633_v6, %v3076_v47  ;;  %v391_v30 = vmul.f32 %v2635_v7, %v3072_v3 }
 0x111   : > { %v1756_v46 = vsel %vm708_vm1, %v1754_v56, %v1755_v51  ;;  %v392_v55 = vmul.f32 %v2635_v7, %v3076_v47  ;;  %v1758_v26 = vsel %vm708_vm1, %v1755_v51, %v1757_v21  ;;  %v393_v35 = vmul.f32 %v2635_v7, %v3079_v20 }
 0x112   : > { %v1857_v14 = vadd.f32 %v1756_v46, %v1616_v42  ;;  %v633_v45 = vmul.f32 %v2637_v8, %v3072_v3  ;;  %v1858_v15 = vadd.f32 %v1758_v26, %v1617_v31  ;;  %v502_v28 = vrot.slane %v391_v30, 1 }
 0x113   : > { %v503_v52 = vrot.slane %v392_v55, 1  ;;  %v634_v44 = vmul.f32 %v2637_v8, %v3076_v47  ;;  %v505_v32 = vrot.slane %v393_v35, 1  ;;  %v635_v58 = vmul.f32 %v2637_v8, %v3079_v20 }
 0x114   : > { %v1921_v59 = vadd.f32 %v1889_v18, %v1857_v14  ;;  %v744_v61 = vrot.slane %v633_v45, 2  ;;  %v1922_v50 = vadd.f32 %v1890_v62, %v1858_v15  ;;  %v868_v33 = vmul.f32 %v3943_v27, %v2644_v9 }
 0x115   : > { %v504_v41 = vsel %vm466_vm0, %v502_v28, %v503_v52  ;;  %v745_v54 = vrot.slane %v634_v44, 2  ;;  %v506_v0 = vsel %vm466_vm0, %v503_v52, %v505_v32  ;;  %v747_v5 = vrot.slane %v635_v58, 2  ;;  %v3952_v28 = vld [vmem:[#allocation9_spill] sm:$0xff] }
 0x116   : > { %v1957_v3 = vadd.f32 %v3241_v24, %v1921_v59  ;;  %v593_v4 = vadd.f32 %v504_v41, %v351_v63  ;;  %v1958_v47 = vadd.f32 %v3241_v24, %v1922_v50  ;;  %v594_v23 = vadd.f32 %v506_v0, %v352_v38  ;;  %v3953_v50 = vld [vmem:[#allocation10_spill] sm:$0xff] }
 0x117   : > { %v746_v49 = vsel %vm708_vm1, %v744_v61, %v745_v54  ;;  %v869_v20 = vmul.f32 %v3944_v60, %v2644_v9  ;;  %v748_v42 = vsel %vm708_vm1, %v745_v54, %v747_v5  ;;  %v908_v51 = vmul.f32 %v3943_v27, %v2646_v10 }
 0x118   : > { %v1989_v39 = vmax.f32 %v1957_v3, 0.0  ;;  %v835_v56 = vadd.f32 %v746_v49, %v593_v4  ;;  %v1990_v31 = vmax.f32 %v1958_v47, 0.0  ;;  %v836_v21 = vadd.f32 %v748_v42, %v594_v23 }
 0x119   : > { %v909_v63 = vmul.f32 %v3944_v60, %v2646_v10  ;;  %v910_v24 = vmul.f32 %v2646_v10, %v3945_v25  ;;  %v1018_v18 = vrot.slane %v908_v51, 1  ;;  %v1149_v62 = vmul.f32 %v3943_v27, %v2648_v11 }
 0x11a   : > { %v1150_v46 = vmul.f32 %v3944_v60, %v2648_v11  ;;  %v1151_v38 = vmul.f32 %v2648_v11, %v3945_v25  ;;  %v2018_v30 = vpack.c.bf16 %v1990_v31, %v1989_v39  ;;  %v1383_v14 = vmul.f32 %v2650_v12, %v2847_v37 }
 0x11b   : > { %v1019_v55 = vrot.slane %v909_v63, 1  ;;  %v1021_v26 = vrot.slane %v910_v24, 1  ;;  %v1259_v35 = vrot.slane %v1149_v62, 2  ;;  %v1384_v52 = vmul.f32 %v2650_v12, %v3952_v28 }
 0x11c   : > { %v1260_v45 = vrot.slane %v1150_v46, 2  ;;  %v1262_v15 = vrot.slane %v1151_v38, 2  ;;  %2122 = vmatmul.bf16.gmra.mxu0 %v2018_v30  ;;  %v1423_v25 = vmul.f32 %v2655_v16, %v2847_v37  ;;  %v1424_v44 = vmul.f32 %v2655_v16, %v3952_v28 }
 0x11d   : > { %v1020_v27 = vsel %vm466_vm0, %v1018_v18, %v1019_v55  ;;  %v1022_v60 = vsel %vm466_vm0, %v1019_v55, %v1021_v26  ;;  %v1425_v41 = vmul.f32 %v2655_v16, %v3953_v50  ;;  %v1664_v0 = vmul.f32 %v2657_v17, %v2847_v37 }
 0x11e   : > { %v1109_v59 = vadd.f32 %v1020_v27, %v868_v33  ;;  %v1110_v32 = vadd.f32 %v1022_v60, %v869_v20  ;;  %v1261_v58 = vsel %vm708_vm1, %v1259_v35, %v1260_v45  ;;  %v1263_v61 = vsel %vm708_vm1, %v1260_v45, %v1262_v15 }
 0x11f   : > { %v1533_v54 = vrot.slane %v1423_v25, 1  ;;  %v1534_v3 = vrot.slane %v1424_v44, 1  ;;  %v1665_v47 = vmul.f32 %v2657_v17, %v3952_v28  ;;  %v1666_v33 = vmul.f32 %v2657_v17, %v3953_v50 }
 0x120   : > { %v1350_v4 = vadd.f32 %v1261_v58, %v1109_v59  ;;  %v1351_v5 = vadd.f32 %v1263_v61, %v1110_v32  ;;  %v1536_v49 = vrot.slane %v1425_v41, 1  ;;  %v1774_v20 = vrot.slane %v1664_v0, 2 }
 0x121   : > { %v1535_v23 = vsel %vm466_vm0, %v1533_v54, %v1534_v3  ;;  %v359_v39 = vmul.f32 %v2633_v6, %v3143_v13  ;;  %v1775_v51 = vrot.slane %v1665_v47, 2  ;;  %v1777_v31 = vrot.slane %v1666_v33, 2 }
 0x122   : > { %v1624_v42 = vadd.f32 %v1535_v23, %v1383_v14  ;;  %v1897_v63 = vadd.f32 %v1350_v4, %v835_v56  ;;  %v1537_v37 = vsel %vm466_vm0, %v1534_v3, %v1536_v49  ;;  %v1898_v24 = vadd.f32 %v1351_v5, %v836_v21 }
 0x123   : > { %v360_v18 = vmul.f32 %v2633_v6, %v3146_v1  ;;  %v403_v62 = vmul.f32 %v2635_v7, %v3143_v13  ;;  %v1625_v46 = vadd.f32 %v1537_v37, %v1384_v52  ;;  %v1776_v38 = vsel %vm708_vm1, %v1774_v20, %v1775_v51 }
 0x124   : > { %v1778_v30 = vsel %vm708_vm1, %v1775_v51, %v1777_v31  ;;  %v404_v55 = vmul.f32 %v2635_v7, %v3146_v1  ;;  %v1865_v26 = vadd.f32 %v1776_v38, %v1624_v42  ;;  %v405_v56 = vmul.f32 %v2635_v7, %v3148_v34 }
 0x125   : > { %v522_v14 = vrot.slane %v403_v62, 1  ;;  %v645_v21 = vmul.f32 %v2637_v8, %v3143_v13  ;;  %v1866_v35 = vadd.f32 %v1778_v30, %v1625_v46  ;;  %v646_v15 = vmul.f32 %v2637_v8, %v3146_v1  ;;  %v3691_v13 = vld [vmem:[%s3896_s2] ss:$0 sm:$0xff] }
 0x126   : > { %v523_v45 = vrot.slane %v404_v55, 1  ;;  %v647_v28 = vmul.f32 %v2637_v8, %v3148_v34  ;;  %v1929_v52 = vadd.f32 %v1897_v63, %v1865_v26  ;;  %v525_v27 = vrot.slane %v405_v56, 1 }
 0x127   : > { %v764_v60 = vrot.slane %v645_v21, 2  ;;  %v876_v25 = vmul.f32 %v3946_v40, %v2644_v9  ;;  %v1930_v44 = vadd.f32 %v1898_v24, %v1866_v35  ;;  %v765_v32 = vrot.slane %v646_v15, 2 }
 0x128   : > { %v524_v59 = vsel %vm466_vm0, %v522_v14, %v523_v45  ;;  %v767_v58 = vrot.slane %v647_v28, 2  ;;  %v1965_v1 = vadd.f32 %v3691_v13, %v1929_v52  ;;  %v526_v34 = vsel %vm466_vm0, %v523_v45, %v525_v27  ;;  %v3955_v45 = vld [vmem:[#allocation15_spill] sm:$0xff] }
 0x129   : > { %v601_v61 = vadd.f32 %v524_v59, %v359_v39  ;;  %v877_v50 = vmul.f32 %v3947_v19, %v2644_v9  ;;  %v1966_v41 = vadd.f32 %v3691_v13, %v1930_v44  ;;  %v602_v54 = vadd.f32 %v526_v34, %v360_v18  ;;  %v279_v28 = vld [vmem:[%s2642_s10 + $0xcc] sm:$0xff]  }
 0x12a   : > { %v766_v3 = vsel %vm708_vm1, %v764_v60, %v765_v32  ;;  %v768_v0 = vsel %vm708_vm1, %v765_v32, %v767_v58  ;;  %v1997_v4 = vmax.f32 %v1965_v1, 0.0  ;;  %v920_v47 = vmul.f32 %v3946_v40, %v2646_v10  ;;  %v3734_v1 = vld [vmem:[%s2642_s10 + $0xd4] sm:$0x1] }
 0x12b   : > { %v843_v5 = vadd.f32 %v766_v3, %v601_v61  ;;  %v921_v33 = vmul.f32 %v3947_v19, %v2646_v10  ;;  %v1998_v23 = vmax.f32 %v1966_v41, 0.0  ;;  %v844_v49 = vadd.f32 %v768_v0, %v602_v54 }
 0x12c   : > { %v922_v20 = vmul.f32 %v2646_v10, %v3948_v48  ;;  %v1161_v39 = vmul.f32 %v3946_v40, %v2648_v11  ;;  %v1038_v42 = vrot.slane %v920_v47, 1  ;;  %v1162_v31 = vmul.f32 %v3947_v19, %v2648_v11  ;;  %v3954_v40 = vld [vmem:[#allocation14_spill] sm:$0xff] }
 0x12d   : > { %v1039_v51 = vrot.slane %v921_v33, 1  ;;  %v1163_v63 = vmul.f32 %v2648_v11, %v3948_v48  ;;  %v2022_v37 = vpack.c.bf16 %v1998_v23, %v1997_v4  ;;  %v1391_v62 = vmul.f32 %v2650_v12, %v2934_v43 }
 0x12e   : > { %v1041_v24 = vrot.slane %v922_v20, 1  ;;  %v1279_v18 = vrot.slane %v1161_v39, 2  ;;  %v1280_v38 = vrot.slane %v1162_v31, 2  ;;  %v1392_v55 = vmul.f32 %v2650_v12, %v3954_v40  ;;  %v3743_v20 = vpop.f32.mrf.mxu0  ;;  %v3745_v39 = vpop.f32.mrf.mxu1 }
 0x12f   : > { %v1040_v46 = vsel %vm466_vm0, %v1038_v42, %v1039_v51  ;;  %v1282_v30 = vrot.slane %v1163_v63, 2  ;;  %2142 = vmatmul.bf16.gmra.mxu1 %v2022_v37  ;;  %v1435_v48 = vmul.f32 %v2655_v16, %v2934_v43  ;;  %v1436_v56 = vmul.f32 %v2655_v16, %v3954_v40  ;;  %v3753_v63 = vpop.f32.mrf.mxu2 }
 0x130   : > { %v1042_v19 = vsel %vm466_vm0, %v1039_v51, %v1041_v24  ;;  %v1117_v26 = vadd.f32 %v1040_v46, %v876_v25  ;;  %v1281_v21 = vsel %vm708_vm1, %v1279_v18, %v1280_v38  ;;  %v1437_v15 = vmul.f32 %v2655_v16, %v3955_v45 }
 0x131   : > { %v1118_v14 = vadd.f32 %v1042_v19, %v877_v50  ;;  %v1283_v35 = vsel %vm708_vm1, %v1280_v38, %v1282_v30  ;;  %v1553_v27 = vrot.slane %v1435_v48, 1  ;;  %v1554_v60 = vrot.slane %v1436_v56, 1 }
 0x132   : > { %v1358_v52 = vadd.f32 %v1281_v21, %v1117_v26  ;;  %v1676_v25 = vmul.f32 %v2657_v17, %v2934_v43  ;;  %v1556_v59 = vrot.slane %v1437_v15, 1  ;;  %v1677_v32 = vmul.f32 %v2657_v17, %v3954_v40 }
 0x133   : > { %v1359_v44 = vadd.f32 %v1283_v35, %v1118_v14  ;;  %v1678_v58 = vmul.f32 %v2657_v17, %v3955_v45  ;;  %v1555_v34 = vsel %vm466_vm0, %v1553_v27, %v1554_v60  ;;  %v3737_v41 = vunpack.c.l.bf16 %v279_v28 }
 0x134   : > { %v1794_v61 = vrot.slane %v1676_v25, 2  ;;  %v1905_v50 = vadd.f32 %v1358_v52, %v843_v5  ;;  %v1557_v54 = vsel %vm466_vm0, %v1554_v60, %v1556_v59  ;;  %v1632_v3 = vadd.f32 %v1555_v34, %v1391_v62 }
 0x135   : > { %v1795_v43 = vrot.slane %v1677_v32, 2  ;;  %v1797_v0 = vrot.slane %v1678_v58, 2  ;;  %v1633_v4 = vadd.f32 %v1557_v54, %v1392_v55  ;;  %v1906_v47 = vadd.f32 %v1359_v44, %v844_v49  ;;  %v3755_v49 = vpop.f32.mrf.mxu3 }
 0x136   : > { %v3740_v33 = vunpack.c.h.bf16 %v279_v28  ;;  %v335_v23 = vunpack.c.l.bf16 %v3734_v1  ;;  %v367_v51 = vmul.f32 %v2633_v6, %v3212_v36  ;;  %v368_v31 = vmul.f32 %v2633_v6, %v3216_v29  ;;  %v2110_v25 = vpop.f32.mrf.mxu0  ;;  %v3779_v44 = vpop.f32.mrf.mxu1 }
 0x137   : > { %v1796_v42 = vsel %vm708_vm1, %v1794_v61, %v1795_v43  ;;  %v1798_v5 = vsel %vm708_vm1, %v1795_v43, %v1797_v0  ;;  %v415_v18 = vmul.f32 %v2635_v7, %v3212_v36  ;;  %v416_v62 = vmul.f32 %v2635_v7, %v3216_v29  ;;  %v3787_v61 = vpop.f32.mrf.mxu2 }
 0x138   : > { %v1873_v37 = vadd.f32 %v1796_v42, %v1632_v3  ;;  %v1874_v24 = vadd.f32 %v1798_v5, %v1633_v4  ;;  %v417_v46 = vmul.f32 %v2635_v7, %v3219_v2  ;;  %v657_v38 = vmul.f32 %v2637_v8, %v3212_v36 }
 0x139   : > { %v658_v6 = vmul.f32 %v2637_v8, %v3216_v29  ;;  %v659_v30 = vmul.f32 %v2637_v8, %v3219_v2  ;;  %v542_v19 = vrot.slane %v415_v18, 1  ;;  %v543_v26 = vrot.slane %v416_v62, 1 }
 0x13a   : > { %v1937_v40 = vadd.f32 %v1905_v50, %v1873_v37  ;;  %v1938_v55 = vadd.f32 %v1906_v47, %v1874_v24  ;;  %v545_v48 = vrot.slane %v417_v46, 1  ;;  %v784_v56 = vrot.slane %v657_v38, 2  ;;  %v3811_v46 = vld [vmem:[%s3898_s4] ss:$0 sm:$0xff] }
 0x13b   : > { %v785_v14 = vrot.slane %v658_v6, 2  ;;  %v787_v21 = vrot.slane %v659_v30, 2  ;;  %v544_v36 = vsel %vm466_vm0, %v542_v19, %v543_v26  ;;  %v884_v29 = vmul.f32 %v3474_v53, %v2644_v9 }
 0x13c   : > { %v1973_v35 = vadd.f32 %v3691_v13, %v1937_v40  ;;  %v1974_v7 = vadd.f32 %v3691_v13, %v1938_v55  ;;  %v546_v45 = vsel %vm466_vm0, %v543_v26, %v545_v48  ;;  %v609_v8 = vadd.f32 %v544_v36, %v367_v51 }
 0x13d   : > { %v786_v2 = vsel %vm708_vm1, %v784_v56, %v785_v14  ;;  %v788_v15 = vsel %vm708_vm1, %v785_v14, %v787_v21  ;;  %v610_v27 = vadd.f32 %v546_v45, %v368_v31  ;;  %v885_v60 = vmul.f32 %v3477_v22, %v2644_v9  ;;  %v3789_v50 = vpop.f32.mrf.mxu3 }
 0x13e   : > { %v2005_v28 = vmax.f32 %v1973_v35, 0.0  ;;  %v2006_v52 = vmax.f32 %v1974_v7, 0.0  ;;  %v851_v59 = vadd.f32 %v786_v2, %v609_v8  ;;  %v932_v32 = vmul.f32 %v3474_v53, %v2646_v10  ;;  %v2113_v48 = vpop.f32.mrf.mxu0  ;;  %v2133_v56 = vpop.f32.mrf.mxu1 }
 0x13f   : > { %v933_v58 = vmul.f32 %v3477_v22, %v2646_v10  ;;  %v934_v34 = vmul.f32 %v2646_v10, %v3479_v57  ;;  %v852_v3 = vadd.f32 %v788_v15, %v610_v27  ;;  %v1173_v9 = vmul.f32 %v3474_v53, %v2648_v11  ;;  %v2153_v7 = vpop.f32.mrf.mxu2 }
 0x140   : > { %v2026_v54 = vpack.c.bf16 %v2006_v52, %v2005_v28  ;;  %v1174_v43 = vmul.f32 %v3477_v22, %v2648_v11  ;;  %v1058_v0 = vrot.slane %v932_v32, 1  ;;  %v1175_v42 = vmul.f32 %v2648_v11, %v3479_v57 }
 0x141   : > { %v1059_v4 = vrot.slane %v933_v58, 1  ;;  %v1061_v47 = vrot.slane %v934_v34, 1  ;;  %v1299_v10 = vrot.slane %v1173_v9, 2  ;;  %v1399_v51 = vmul.f32 %v2650_v12, %v3737_v41 }
 0x142   : > { %2162 = vmatmul.bf16.gmra.mxu2 %v2026_v54  ;;  %v1300_v5 = vrot.slane %v1174_v43, 2  ;;  %v1400_v31 = vmul.f32 %v2650_v12, %v3740_v33  ;;  %v1302_v22 = vrot.slane %v1175_v42, 2  ;;  %v1447_v24 = vmul.f32 %v2655_v16, %v3737_v41 }
 0x143   : > { %v1060_v53 = vsel %vm466_vm0, %v1058_v0, %v1059_v4  ;;  %v1062_v37 = vsel %vm466_vm0, %v1059_v4, %v1061_v47  ;;  %v1448_v57 = vmul.f32 %v2655_v16, %v3740_v33  ;;  %v1449_v38 = vmul.f32 %v2655_v16, %v335_v23 }
 0x144   : > { %v1125_v18 = vadd.f32 %v1060_v53, %v884_v29  ;;  %v1126_v62 = vadd.f32 %v1062_v37, %v885_v60  ;;  %v1301_v11 = vsel %vm708_vm1, %v1299_v10, %v1300_v5  ;;  %v1303_v12 = vsel %vm708_vm1, %v1300_v5, %v1302_v22 }
 0x145   : > { %v1573_v6 = vrot.slane %v1447_v24, 1  ;;  %v1688_v30 = vmul.f32 %v2657_v17, %v3737_v41  ;;  %v1574_v19 = vrot.slane %v1448_v57, 1  ;;  %v1689_v26 = vmul.f32 %v2657_v17, %v3740_v33  ;;  %v2173_v16 = vpop.f32.mrf.mxu3 }
 0x146   : > { %v1366_v40 = vadd.f32 %v1301_v11, %v1125_v18  ;;  %v1367_v55 = vadd.f32 %v1303_v12, %v1126_v62  ;;  %v1576_v14 = vrot.slane %v1449_v38, 1  ;;  %v1690_v21 = vmul.f32 %v2657_v17, %v335_v23  ;;  %v2135_v42 = vpop.f32.mrf.mxu1 }
 0x147   : > { %v1814_v35 = vrot.slane %v1688_v30, 2  ;;  %v1575_v36 = vsel %vm466_vm0, %v1573_v6, %v1574_v19  ;;  %v1815_v41 = vrot.slane %v1689_v26, 2  ;;  %v2109_v45 = vadd.f32 %v3811_v46, %v3743_v20  ;;  %v2155_v53 = vpop.f32.mrf.mxu2 }
 0x148   : > { %v1913_v29 = vadd.f32 %v1366_v40, %v851_v59  ;;  %v1577_v33 = vsel %vm466_vm0, %v1574_v19, %v1576_v14  ;;  %v1640_v8 = vadd.f32 %v1575_v36, %v1399_v51  ;;  %v1817_v2 = vrot.slane %v1690_v21, 2 }
 0x149   : > { %v1914_v15 = vadd.f32 %v1367_v55, %v852_v3  ;;  %v1641_v28 = vadd.f32 %v1577_v33, %v1400_v31  ;;  %v1816_v1 = vsel %vm708_vm1, %v1814_v35, %v1815_v41  ;;  %v2129_v17 = vadd.f32 %v3811_v46, %v3745_v39 }
 0x14a   : > { %v2149_v23 = vadd.f32 %v3811_v46, %v3753_v63  ;;  %v1818_v52 = vsel %vm708_vm1, %v1815_v41, %v1817_v2  ;;  %v1881_v27 = vadd.f32 %v1816_v1, %v1640_v8  ;;  %v2169_v20 = vadd.f32 %v3811_v46, %v3755_v49 }
 0x14b   : > { %v2111_v60 = vadd.f32 %v3811_v46, %v2110_v25  ;;  %v1882_v59 = vadd.f32 %v1818_v52, %v1641_v28  ;;  %v2188_v32 = vmax.f32 %v2109_v45, 0.0  ;;  %v2196_v58 = vmax.f32 %v2129_v17, 0.0 }
 0x14c   : > { %v2131_v34 = vadd.f32 %v3811_v46, %v3779_v44  ;;  %v1945_v54 = vadd.f32 %v1913_v29, %v1881_v27  ;;  %v2204_v39 = vmax.f32 %v2149_v23, 0.0  ;;  %v2151_v63 = vadd.f32 %v3811_v46, %v3787_v61  ;;  %v2115_v61 = vpop.f32.mrf.mxu0 }
 0x14d   : > { %v2189_v3 = vmax.f32 %v2111_v60, 0.0  ;;  %v1946_v9 = vadd.f32 %v1914_v15, %v1882_v59  ;;  %v2212_v43 = vmax.f32 %v2169_v20, 0.0  ;;  %v2171_v25 = vadd.f32 %v3811_v46, %v3789_v50  ;;  %v2175_v37 = vpop.f32.mrf.mxu3 }
 0x14e   : > { %v2197_v49 = vmax.f32 %v2131_v34, 0.0  ;;  %v1981_v44 = vadd.f32 %v3691_v13, %v1945_v54  ;;  %v2205_v4 = vmax.f32 %v2151_v63, 0.0  ;;  %v2114_v47 = vadd.f32 %v3811_v46, %v2113_v48 }
 0x14f   : > { %v2429_v0 = vpack.c.bf16 %v2189_v3, %v2188_v32  ;;  %v1982_v10 = vadd.f32 %v3691_v13, %v1946_v9  ;;  %v2213_v51 = vmax.f32 %v2171_v25, 0.0  ;;  %v2134_v31 = vadd.f32 %v3811_v46, %v2133_v56 }
 0x150   : > { %v2449_v5 = vpack.c.bf16 %v2197_v49, %v2196_v58  ;;  %v2013_v50 = vmax.f32 %v1981_v44, 0.0  ;;  %v2469_v22 = vpack.c.bf16 %v2205_v4, %v2204_v39  ;;  %v2154_v24 = vadd.f32 %v3811_v46, %v2153_v7 }
 0x151   : > { %2430 = vst [vmem:[%s3845_s19] sm:$0xff] %v2429_v0   ;;  %v2014_v18 = vmax.f32 %v1982_v10, 0.0  ;;  %v2489_v62 = vpack.c.bf16 %v2213_v51, %v2212_v43  ;;  %v2174_v11 = vadd.f32 %v3811_v46, %v2173_v16  ;;  %v2116_v57 = vadd.f32 %v3811_v46, %v2115_v61 }
 0x152   : > { %2517 = vst [vmem:[%s3845_s19 + $0x20] sm:$0xff] %v2449_v5   ;;  %v2190_v13 = vmax.f32 %v2114_v47, 0.0  ;;  %v2136_v12 = vadd.f32 %v3811_v46, %v2135_v42  ;;  %v2156_v38 = vadd.f32 %v3811_v46, %v2155_v53  ;;  %v2176_v6 = vadd.f32 %v3811_v46, %v2175_v37 }
 0x153   : > { %2521 = vst [vmem:[%s3845_s19 + $0x40] sm:$0xff] %v2469_v22   ;;  %v2030_v30 = vpack.c.bf16 %v2014_v18, %v2013_v50  ;;  %v2198_v40 = vmax.f32 %v2134_v31, 0.0  ;;  %v2206_v55 = vmax.f32 %v2154_v24, 0.0  ;;  %v2191_v19 = vmax.f32 %v2116_v57, 0.0 }
 0x154   : > { %2525 = vst [vmem:[%s3845_s19 + $0x60] sm:$0xff] %v2489_v62   ;;  %v2214_v26 = vmax.f32 %v2174_v11, 0.0  ;;  %v2199_v48 = vmax.f32 %v2136_v12, 0.0  ;;  %v2207_v56 = vmax.f32 %v2156_v38, 0.0  ;;  %v2215_v14 = vmax.f32 %v2176_v6, 0.0  ;;  %v2118_v36 = vpop.f32.mrf.mxu0 }
 0x155   : > { %2182 = vmatmul.bf16.gmra.mxu3 %v2030_v30  ;;  %v2434_v21 = vpack.c.bf16 %v2191_v19, %v2190_v13  ;;  %v2119_v29 = vadd.f32 %v3811_v46, %v2118_v36 }
 0x156   : > { %v2454_v35 = vpack.c.bf16 %v2199_v48, %v2198_v40  ;;  %v2474_v7 = vpack.c.bf16 %v2207_v56, %v2206_v55  ;;  %v2494_v16 = vpack.c.bf16 %v2215_v14, %v2214_v26 }
 0x157   : > { %2514 = vst [vmem:[%s3845_s19 + $0x8] sm:$0xff] %v2434_v21   ;;  %v2192_v28 = vmax.f32 %v2119_v29, 0.0 }
 0x158   : > { %2518 = vst [vmem:[%s3845_s19 + $0x28] sm:$0xff] %v2454_v35  }
 0x159   : > { %2522 = vst [vmem:[%s3845_s19 + $0x48] sm:$0xff] %v2474_v7  }
 0x15a   : > { %2526 = vst [vmem:[%s3845_s19 + $0x68] sm:$0xff] %v2494_v16  }
 0x15c   : > { %v2120_v33 = vpop.f32.mrf.mxu0 }
 0x15d   : > { %v2121_v2 = vadd.f32 %v3811_v46, %v2120_v33 }
 0x15f   : > { %v2193_v17 = vmax.f32 %v2121_v2, 0.0 }
 0x160   : > { %v2138_v41 = vpop.f32.mrf.mxu1 }
 0x161   : > { %v2139_v45 = vadd.f32 %v3811_v46, %v2138_v41  ;;  %v2439_v52 = vpack.c.bf16 %v2193_v17, %v2192_v28 }
 0x163   : > { %v2200_v1 = vmax.f32 %v2139_v45, 0.0  ;;  %2515 = vst [vmem:[%s3845_s19 + $0x10] sm:$0xff] %v2439_v52  }
 0x168   : > { %v2140_v8 = vpop.f32.mrf.mxu1 }
 0x169   : > { %v2141_v15 = vadd.f32 %v3811_v46, %v2140_v8 }
 0x16b   : > { %v2201_v23 = vmax.f32 %v2141_v15, 0.0 }
 0x16d   : > { %v2459_v27 = vpack.c.bf16 %v2201_v23, %v2200_v1 }
 0x16f   : > { %2519 = vst [vmem:[%s3845_s19 + $0x30] sm:$0xff] %v2459_v27  }
 0x179   : > { %v2158_v20 = vpop.f32.mrf.mxu2 }
 0x17a   : > { %v2159_v60 = vadd.f32 %v3811_v46, %v2158_v20 }
 0x17c   : > { %v2208_v58 = vmax.f32 %v2159_v60, 0.0 }
 0x181   : > { %v2160_v59 = vpop.f32.mrf.mxu2 }
 0x182   : > { %v2161_v32 = vadd.f32 %v3811_v46, %v2160_v59 }
 0x184   : > { %v2209_v34 = vmax.f32 %v2161_v32, 0.0 }
 0x186   : > { %v2479_v54 = vpack.c.bf16 %v2209_v34, %v2208_v58 }
 0x188   : > { %2523 = vst [vmem:[%s3845_s19 + $0x50] sm:$0xff] %v2479_v54  }
 0x18d   : > { %v2178_v39 = vpop.f32.mrf.mxu3 }
 0x18e   : > { %v2179_v3 = vadd.f32 %v3811_v46, %v2178_v39 }
 0x190   : > { %v2216_v43 = vmax.f32 %v2179_v3, 0.0 }
 0x195   : > { %v2180_v63 = vpop.f32.mrf.mxu3 }
 0x196   : > { %v2181_v9 = vadd.f32 %v3811_v46, %v2180_v63 }
 0x198   : > { %v2217_v49 = vmax.f32 %v2181_v9, 0.0 }
 0x199   : > { %v2123_v44 = vpop.f32.mrf.mxu0 }
 0x19a   : > { %v2499_v25 = vpack.c.bf16 %v2217_v49, %v2216_v43  ;;  %v2124_v4 = vadd.f32 %v3811_v46, %v2123_v44 }
 0x19c   : > { %2527 = vst [vmem:[%s3845_s19 + $0x70] sm:$0xff] %v2499_v25   ;;  %v2194_v51 = vmax.f32 %v2124_v4, 0.0 }
 0x1a1   : > { %v2125_v61 = vpop.f32.mrf.mxu0 }
 0x1a2   : > { %v2126_v10 = vadd.f32 %v3811_v46, %v2125_v61 }
 0x1a4   : > { %v2195_v53 = vmax.f32 %v2126_v10, 0.0 }
 0x1a6   : > { %v2444_v50 = vpack.c.bf16 %v2195_v53, %v2194_v51 }
 0x1a8   : > { %2516 = vst [vmem:[%s3845_s19 + $0x18] sm:$0xff] %v2444_v50  }
 0x1ac   : > { %v2143_v0 = vpop.f32.mrf.mxu1 }
 0x1ad   : > { %v2144_v47 = vadd.f32 %v3811_v46, %v2143_v0 }
 0x1af   : > { %v2202_v31 = vmax.f32 %v2144_v47, 0.0 }
 0x1b4   : > { %v2145_v42 = vpop.f32.mrf.mxu1 }
 0x1b5   : > { %v2146_v5 = vadd.f32 %v3811_v46, %v2145_v42 }
 0x1b7   : > { %v2203_v37 = vmax.f32 %v2146_v5, 0.0 }
 0x1b9   : > { %v2464_v22 = vpack.c.bf16 %v2203_v37, %v2202_v31 }
 0x1bb   : > { %2520 = vst [vmem:[%s3845_s19 + $0x38] sm:$0xff] %v2464_v22  }
 0x1c5   : > { %v2163_v24 = vpop.f32.mrf.mxu2 }
 0x1c6   : > { %v2164_v18 = vadd.f32 %v3811_v46, %v2163_v24 }
 0x1c8   : > { %v2210_v57 = vmax.f32 %v2164_v18, 0.0 }
 0x1cd   : > { %v2165_v62 = vpop.f32.mrf.mxu2 }
 0x1ce   : > { %v2166_v11 = vadd.f32 %v3811_v46, %v2165_v62 }
 0x1d0   : > { %v2211_v13 = vmax.f32 %v2166_v11, 0.0 }
 0x1d2   : > { %v2484_v12 = vpack.c.bf16 %v2211_v13, %v2210_v57 }
 0x1d4   : > { %2524 = vst [vmem:[%s3845_s19 + $0x58] sm:$0xff] %v2484_v12  }
 0x1d8   : > { %v2183_v38 = vpop.f32.mrf.mxu3 }
 0x1d9   : > { %v2184_v6 = vadd.f32 %v3811_v46, %v2183_v38 }
 0x1db   : > { %v2218_v55 = vmax.f32 %v2184_v6, 0.0 }
 0x1e0   : > { %v2185_v30 = vpop.f32.mrf.mxu3 }
 0x1e1   : > { %v2186_v40 = vadd.f32 %v3811_v46, %v2185_v30 }
 0x1e3   : > { %v2219_v19 = vmax.f32 %v2186_v40, 0.0 }
 0x1e5   : > { %v2504_v26 = vpack.c.bf16 %v2219_v19, %v2218_v55 }
 0x1e7   : > { %2528 = vst [vmem:[%s3845_s19 + $0x78] sm:$0xff] %v2504_v26  }
 0x1e8 PF: > { %s15_s18 = sadd.s32 1, %s2572_s18  }
 0x1e9   : > { %p12_p4 = scmp.ge.s32.totalorder %s15_s18, 4  }
 0x1eb   :  { %14 = sbr.rel (!%p12_p4) target bundleno = 1 (0x1), region = 70 }

</bundles_post_ra>
